<compile_context>
chip_gen: v7x
topology: tpu7x:2x2x1
jax: 0.10.0
libtpu: 0.0.40
codegen_flags: <defaults>
</compile_context>

<pallas_src>
import math

import jax
import jax.numpy as jnp
import numpy as np
from jax import lax
from jax.experimental import pallas as pl
from jax.experimental.pallas import tpu as pltpu

_BN_EPS = 1e-5
_SQRT_HALF = np.float32(math.sqrt(0.5))


def _make_feat_transformer_kernel(num_layers: int):
    def kernel(*refs):
        x_ref = refs[0]
        out_ref = refs[-1]
        prm = refs[1:-1]  # 6 refs per layer: wa, wg, ga, gg, ba, bg

        def ghost_bn(z, gamma_ref, beta_ref):
            # Training-mode BatchNorm1d over the current virtual batch (= tile):
            # biased variance, eps=1e-5, then per-feature affine.
            mean = jnp.mean(z, axis=0, keepdims=True)
            c = z - mean
            var = jnp.mean(c * c, axis=0, keepdims=True)
            return c * lax.rsqrt(var + jnp.float32(_BN_EPS)) * gamma_ref[...] + beta_ref[...]

        def glu_layer(h, wa_ref, wg_ref, ga_ref, gg_ref, ba_ref, bg_ref):
            # fc (no bias); weight columns already split into value/gate halves.
            za = jnp.dot(h, wa_ref[...], preferred_element_type=jnp.float32)
            zg = jnp.dot(h, wg_ref[...], preferred_element_type=jnp.float32)
            a = ghost_bn(za, ga_ref, ba_ref)
            g = ghost_bn(zg, gg_ref, bg_ref)
            return a * (1.0 / (1.0 + jnp.exp(-g)))

        h = x_ref[...].astype(jnp.float32)
        # First GLU layer of the whole transformer: no residual, no scale.
        h = glu_layer(h, *prm[0:6])
        # Every remaining layer (rest of shared block + all independent layers):
        # residual add then multiply by sqrt(0.5).
        for li in range(1, num_layers):
            base = 6 * li
            h = (h + glu_layer(h, *prm[base:base + 6])) * _SQRT_HALF

        out_ref[...] = h.astype(out_ref.dtype)

    return kernel


def feat_transformer_forward(x, layer_params, *, virtual_batch_size=128):
    """Pallas implementation of FeatTransformer.forward (training-mode GBN).

    x:            (bs, input_dim) float32
    layer_params: list over the concatenated (shared + independent) GLU layers of
                  tuples (W, gamma, beta) with
                      W:     (in_dim_i, 2*output_dim)   fc weight (no bias),
                             in_dim_0 = input_dim, in_dim_{i>0} = output_dim
                      gamma: (2*output_dim,)            BN weight
                      beta:  (2*output_dim,)            BN bias
    returns (bs, output_dim)
    """
    bs, input_dim = x.shape
    num_layers = len(layer_params)
    assert num_layers >= 1
    output_dim = layer_params[0][0].shape[1] // 2

    # One grid step per GBN virtual batch so in-tile batch statistics match
    # torch's chunked BatchNorm1d exactly.
    tm = min(int(virtual_batch_size), bs)
    assert bs % tm == 0, "batch size must be a multiple of virtual_batch_size"
    assert tm % 8 == 0 or tm == bs, "virtual batch tile must be sublane-aligned"

    flat_inputs = [x]
    in_specs = [pl.BlockSpec((tm, input_dim), lambda i: (i, 0))]
    for (W, gamma, beta) in layer_params:
        in_dim = W.shape[0]
        # Split fc columns / BN affines into value & gate halves (layout
        # plumbing done once outside the kernel).
        wa = W[:, :output_dim]
        wg = W[:, output_dim:]
        ga = gamma[:output_dim].reshape(1, output_dim)
        gg = gamma[output_dim:].reshape(1, output_dim)
        ba = beta[:output_dim].reshape(1, output_dim)
        bg = beta[output_dim:].reshape(1, output_dim)
        flat_inputs += [wa, wg, ga, gg, ba, bg]
        in_specs += [
            pl.BlockSpec((in_dim, output_dim), lambda i: (0, 0)),
            pl.BlockSpec((in_dim, output_dim), lambda i: (0, 0)),
            pl.BlockSpec((1, output_dim), lambda i: (0, 0)),
            pl.BlockSpec((1, output_dim), lambda i: (0, 0)),
            pl.BlockSpec((1, output_dim), lambda i: (0, 0)),
            pl.BlockSpec((1, output_dim), lambda i: (0, 0)),
        ]

    kernel = _make_feat_transformer_kernel(num_layers)

    return pl.pallas_call(
        kernel,
        out_shape=jax.ShapeDtypeStruct((bs, output_dim), x.dtype),
        grid=(bs // tm,),
        in_specs=in_specs,
        out_specs=pl.BlockSpec((tm, output_dim), lambda i: (i, 0)),
        compiler_params=pltpu.CompilerParams(
            dimension_semantics=("parallel",),
        ),
    )(*flat_inputs)


if __name__ == "__main__":
    key = jax.random.PRNGKey(0)
    bs = 16
    input_dim = 24
    output_dim = 32
    virtual_batch_size = 8
    n_shared = 2            # len(shared_layers)
    n_glu_independent = 2   # independent GLU layers
    num_layers = n_shared + n_glu_independent

    keys = jax.random.split(key, 1 + 3 * num_layers)
    x = jax.random.normal(keys[0], (bs, input_dim), dtype=jnp.float32)

    layer_params = []
    for li in range(num_layers):
        in_dim = input_dim if li == 0 else output_dim
        kw, kg, kb = keys[1 + 3 * li], keys[2 + 3 * li], keys[3 + 3 * li]
        # Xavier-normal-ish init (matches initialize_glu's spirit; exact RNG
        # equivalence with torch is not required for kernel correctness).
        gain = math.sqrt((in_dim + 2 * output_dim) / math.sqrt(in_dim))
        std = gain * math.sqrt(2.0 / (in_dim + 2 * output_dim))
        W = std * jax.random.normal(kw, (in_dim, 2 * output_dim), dtype=jnp.float32)
        gamma = 1.0 + 0.1 * jax.random.normal(kg, (2 * output_dim,), dtype=jnp.float32)
        beta = 0.1 * jax.random.normal(kb, (2 * output_dim,), dtype=jnp.float32)
        layer_params.append((W, gamma, beta))

    out = feat_transformer_forward(
        x, layer_params, virtual_batch_size=virtual_batch_size
    )
    jax.block_until_ready(out)

    # Pure-JAX reference replicating the torch forward (training-mode GBN).
    def ref_forward(xin, layers, vbs):
        def gbn(z):
            n_chunks = int(np.ceil(z.shape[0] / vbs))
            outs = []
            for c in jnp.split(z, n_chunks, axis=0):
                m = c.mean(0, keepdims=True)
                v = ((c - m) ** 2).mean(0, keepdims=True)  # biased variance
                outs.append((c - m) / jnp.sqrt(v + _BN_EPS))
            return jnp.concatenate(outs, axis=0)

        def glu(h, W, gamma, beta):
            z = gbn(h @ W) * gamma + beta
            return z[:, :output_dim] * jax.nn.sigmoid(z[:, output_dim:])

        h = glu(xin, *layers[0])
        for (W, g, b) in layers[1:]:
            h = (h + glu(h, W, g, b)) * np.float32(math.sqrt(0.5))
        return h

    expected = ref_forward(x, layer_params, virtual_batch_size)
    assert out.shape == (bs, output_dim)
    max_err = float(jnp.max(jnp.abs(out - expected)))
    assert jnp.allclose(out, expected, atol=1e-4, rtol=1e-4), max_err

    print("KERNEL_OK")
</pallas_src>

<mosaic_0001>
module attributes {stable_mosaic.version = 11 : i64} {
  func.func @kernel(%arg0: i32, %arg1: memref<8x24xf32, #tpu.memory_space<vmem>>, %arg2: memref<24x32xf32, #tpu.memory_space<vmem>>, %arg3: memref<24x32xf32, #tpu.memory_space<vmem>>, %arg4: memref<1x32xf32, #tpu.memory_space<vmem>>, %arg5: memref<1x32xf32, #tpu.memory_space<vmem>>, %arg6: memref<1x32xf32, #tpu.memory_space<vmem>>, %arg7: memref<1x32xf32, #tpu.memory_space<vmem>>, %arg8: memref<32x32xf32, #tpu.memory_space<vmem>>, %arg9: memref<32x32xf32, #tpu.memory_space<vmem>>, %arg10: memref<1x32xf32, #tpu.memory_space<vmem>>, %arg11: memref<1x32xf32, #tpu.memory_space<vmem>>, %arg12: memref<1x32xf32, #tpu.memory_space<vmem>>, %arg13: memref<1x32xf32, #tpu.memory_space<vmem>>, %arg14: memref<32x32xf32, #tpu.memory_space<vmem>>, %arg15: memref<32x32xf32, #tpu.memory_space<vmem>>, %arg16: memref<1x32xf32, #tpu.memory_space<vmem>>, %arg17: memref<1x32xf32, #tpu.memory_space<vmem>>, %arg18: memref<1x32xf32, #tpu.memory_space<vmem>>, %arg19: memref<1x32xf32, #tpu.memory_space<vmem>>, %arg20: memref<32x32xf32, #tpu.memory_space<vmem>>, %arg21: memref<32x32xf32, #tpu.memory_space<vmem>>, %arg22: memref<1x32xf32, #tpu.memory_space<vmem>>, %arg23: memref<1x32xf32, #tpu.memory_space<vmem>>, %arg24: memref<1x32xf32, #tpu.memory_space<vmem>>, %arg25: memref<1x32xf32, #tpu.memory_space<vmem>>, %arg26: memref<8x32xf32, #tpu.memory_space<vmem>>) attributes {dimension_semantics = [#tpu.dimension_semantics<parallel>], iteration_bounds = array<i64: 2>, scalar_prefetch = 0 : i64, scratch_operands = 0 : i64, tpu.core_type = #tpu.core_type<tc>, window_params = [{transform_indices = @transform_0, window_bounds = array<i64: 8, 24>}, {pipeline_mode = #tpu.pipeline_mode<synchronous>, transform_indices = @transform_1, window_bounds = array<i64: 24, 32>}, {pipeline_mode = #tpu.pipeline_mode<synchronous>, transform_indices = @transform_2, window_bounds = array<i64: 24, 32>}, {pipeline_mode = #tpu.pipeline_mode<synchronous>, transform_indices = @transform_3, window_bounds = array<i64: 1, 32>}, {pipeline_mode = #tpu.pipeline_mode<synchronous>, transform_indices = @transform_4, window_bounds = array<i64: 1, 32>}, {pipeline_mode = #tpu.pipeline_mode<synchronous>, transform_indices = @transform_5, window_bounds = array<i64: 1, 32>}, {pipeline_mode = #tpu.pipeline_mode<synchronous>, transform_indices = @transform_6, window_bounds = array<i64: 1, 32>}, {pipeline_mode = #tpu.pipeline_mode<synchronous>, transform_indices = @transform_7, window_bounds = array<i64: 32, 32>}, {pipeline_mode = #tpu.pipeline_mode<synchronous>, transform_indices = @transform_8, window_bounds = array<i64: 32, 32>}, {pipeline_mode = #tpu.pipeline_mode<synchronous>, transform_indices = @transform_9, window_bounds = array<i64: 1, 32>}, {pipeline_mode = #tpu.pipeline_mode<synchronous>, transform_indices = @transform_10, window_bounds = array<i64: 1, 32>}, {pipeline_mode = #tpu.pipeline_mode<synchronous>, transform_indices = @transform_11, window_bounds = array<i64: 1, 32>}, {pipeline_mode = #tpu.pipeline_mode<synchronous>, transform_indices = @transform_12, window_bounds = array<i64: 1, 32>}, {pipeline_mode = #tpu.pipeline_mode<synchronous>, transform_indices = @transform_13, window_bounds = array<i64: 32, 32>}, {pipeline_mode = #tpu.pipeline_mode<synchronous>, transform_indices = @transform_14, window_bounds = array<i64: 32, 32>}, {pipeline_mode = #tpu.pipeline_mode<synchronous>, transform_indices = @transform_15, window_bounds = array<i64: 1, 32>}, {pipeline_mode = #tpu.pipeline_mode<synchronous>, transform_indices = @transform_16, window_bounds = array<i64: 1, 32>}, {pipeline_mode = #tpu.pipeline_mode<synchronous>, transform_indices = @transform_17, window_bounds = array<i64: 1, 32>}, {pipeline_mode = #tpu.pipeline_mode<synchronous>, transform_indices = @transform_18, window_bounds = array<i64: 1, 32>}, {pipeline_mode = #tpu.pipeline_mode<synchronous>, transform_indices = @transform_19, window_bounds = array<i64: 32, 32>}, {pipeline_mode = #tpu.pipeline_mode<synchronous>, transform_indices = @transform_20, window_bounds = array<i64: 32, 32>}, {pipeline_mode = #tpu.pipeline_mode<synchronous>, transform_indices = @transform_21, window_bounds = array<i64: 1, 32>}, {pipeline_mode = #tpu.pipeline_mode<synchronous>, transform_indices = @transform_22, window_bounds = array<i64: 1, 32>}, {pipeline_mode = #tpu.pipeline_mode<synchronous>, transform_indices = @transform_23, window_bounds = array<i64: 1, 32>}, {pipeline_mode = #tpu.pipeline_mode<synchronous>, transform_indices = @transform_24, window_bounds = array<i64: 1, 32>}, {transform_indices = @transform_25, window_bounds = array<i64: 8, 32>}]} {
    %c0 = arith.constant 0 : index
    %c0_0 = arith.constant 0 : index
    %0 = vector.load %arg1[%c0, %c0_0] : memref<8x24xf32, #tpu.memory_space<vmem>>, vector<8x24xf32>
    %c0_1 = arith.constant 0 : index
    %c0_2 = arith.constant 0 : index
    %1 = vector.load %arg2[%c0_1, %c0_2] : memref<24x32xf32, #tpu.memory_space<vmem>>, vector<24x32xf32>
    %cst = arith.constant dense<0.000000e+00> : vector<8x32xf32>
    %2 = tpu.matmul %0, %1, %cst {dimension_numbers = #tpu.dot_dimension_numbers<[1], [0], [0], [1], [0, 0, 1, 1], [], []>} : vector<8x24xf32>, vector<24x32xf32>, vector<8x32xf32> -> vector<8x32xf32>
    %c0_3 = arith.constant 0 : index
    %c0_4 = arith.constant 0 : index
    %3 = vector.load %arg3[%c0_3, %c0_4] : memref<24x32xf32, #tpu.memory_space<vmem>>, vector<24x32xf32>
    %cst_5 = arith.constant dense<0.000000e+00> : vector<8x32xf32>
    %4 = tpu.matmul %0, %3, %cst_5 {dimension_numbers = #tpu.dot_dimension_numbers<[1], [0], [0], [1], [0, 0, 1, 1], [], []>} : vector<8x24xf32>, vector<24x32xf32>, vector<8x32xf32> -> vector<8x32xf32>
    %cst_6 = arith.constant dense<0.000000e+00> : vector<32xf32>
    %5 = vector.multi_reduction <add>, %2, %cst_6 [0] : vector<8x32xf32> to vector<32xf32>
    %6 = vector.shape_cast %5 : vector<32xf32> to vector<1x32xf32>
    %cst_7 = arith.constant 8.000000e+00 : f32
    %7 = vector.broadcast %cst_7 : f32 to vector<1x32xf32>
    %8 = arith.divf %6, %7 : vector<1x32xf32>
    %9 = vector.broadcast %8 : vector<1x32xf32> to vector<8x32xf32>
    %10 = arith.subf %2, %9 : vector<8x32xf32>
    %11 = arith.mulf %10, %10 : vector<8x32xf32>
    %cst_8 = arith.constant dense<0.000000e+00> : vector<32xf32>
    %12 = vector.multi_reduction <add>, %11, %cst_8 [0] : vector<8x32xf32> to vector<32xf32>
    %13 = vector.shape_cast %12 : vector<32xf32> to vector<1x32xf32>
    %cst_9 = arith.constant 8.000000e+00 : f32
    %14 = vector.broadcast %cst_9 : f32 to vector<1x32xf32>
    %15 = arith.divf %13, %14 : vector<1x32xf32>
    %cst_10 = arith.constant 9.99999974E-6 : f32
    %16 = vector.broadcast %cst_10 : f32 to vector<1x32xf32>
    %17 = arith.addf %15, %16 : vector<1x32xf32>
    %18 = math.rsqrt %17 : vector<1x32xf32>
    %19 = vector.broadcast %18 : vector<1x32xf32> to vector<8x32xf32>
    %20 = arith.mulf %10, %19 : vector<8x32xf32>
    %c0_11 = arith.constant 0 : index
    %c0_12 = arith.constant 0 : index
    %21 = vector.load %arg4[%c0_11, %c0_12] : memref<1x32xf32, #tpu.memory_space<vmem>>, vector<1x32xf32>
    %22 = vector.broadcast %21 : vector<1x32xf32> to vector<8x32xf32>
    %23 = arith.mulf %20, %22 : vector<8x32xf32>
    %c0_13 = arith.constant 0 : index
    %c0_14 = arith.constant 0 : index
    %24 = vector.load %arg6[%c0_13, %c0_14] : memref<1x32xf32, #tpu.memory_space<vmem>>, vector<1x32xf32>
    %25 = vector.broadcast %24 : vector<1x32xf32> to vector<8x32xf32>
    %26 = arith.addf %23, %25 : vector<8x32xf32>
    %cst_15 = arith.constant dense<0.000000e+00> : vector<32xf32>
    %27 = vector.multi_reduction <add>, %4, %cst_15 [0] : vector<8x32xf32> to vector<32xf32>
    %28 = vector.shape_cast %27 : vector<32xf32> to vector<1x32xf32>
    %cst_16 = arith.constant 8.000000e+00 : f32
    %29 = vector.broadcast %cst_16 : f32 to vector<1x32xf32>
    %30 = arith.divf %28, %29 : vector<1x32xf32>
    %31 = vector.broadcast %30 : vector<1x32xf32> to vector<8x32xf32>
    %32 = arith.subf %4, %31 : vector<8x32xf32>
    %33 = arith.mulf %32, %32 : vector<8x32xf32>
    %cst_17 = arith.constant dense<0.000000e+00> : vector<32xf32>
    %34 = vector.multi_reduction <add>, %33, %cst_17 [0] : vector<8x32xf32> to vector<32xf32>
    %35 = vector.shape_cast %34 : vector<32xf32> to vector<1x32xf32>
    %cst_18 = arith.constant 8.000000e+00 : f32
    %36 = vector.broadcast %cst_18 : f32 to vector<1x32xf32>
    %37 = arith.divf %35, %36 : vector<1x32xf32>
    %cst_19 = arith.constant 9.99999974E-6 : f32
    %38 = vector.broadcast %cst_19 : f32 to vector<1x32xf32>
    %39 = arith.addf %37, %38 : vector<1x32xf32>
    %40 = math.rsqrt %39 : vector<1x32xf32>
    %41 = vector.broadcast %40 : vector<1x32xf32> to vector<8x32xf32>
    %42 = arith.mulf %32, %41 : vector<8x32xf32>
    %c0_20 = arith.constant 0 : index
    %c0_21 = arith.constant 0 : index
    %43 = vector.load %arg5[%c0_20, %c0_21] : memref<1x32xf32, #tpu.memory_space<vmem>>, vector<1x32xf32>
    %44 = vector.broadcast %43 : vector<1x32xf32> to vector<8x32xf32>
    %45 = arith.mulf %42, %44 : vector<8x32xf32>
    %c0_22 = arith.constant 0 : index
    %c0_23 = arith.constant 0 : index
    %46 = vector.load %arg7[%c0_22, %c0_23] : memref<1x32xf32, #tpu.memory_space<vmem>>, vector<1x32xf32>
    %47 = vector.broadcast %46 : vector<1x32xf32> to vector<8x32xf32>
    %48 = arith.addf %45, %47 : vector<8x32xf32>
    %cst_24 = arith.constant 0.000000e+00 : f32
    %49 = vector.broadcast %cst_24 : f32 to vector<8x32xf32>
    %50 = arith.subf %49, %48 : vector<8x32xf32>
    %51 = math.exp %50 : vector<8x32xf32>
    %cst_25 = arith.constant 1.000000e+00 : f32
    %52 = vector.broadcast %cst_25 : f32 to vector<8x32xf32>
    %53 = arith.addf %52, %51 : vector<8x32xf32>
    %cst_26 = arith.constant 1.000000e+00 : f32
    %54 = vector.broadcast %cst_26 : f32 to vector<8x32xf32>
    %55 = arith.divf %54, %53 : vector<8x32xf32>
    %56 = arith.mulf %26, %55 : vector<8x32xf32>
    %c0_27 = arith.constant 0 : index
    %c0_28 = arith.constant 0 : index
    %57 = vector.load %arg8[%c0_27, %c0_28] : memref<32x32xf32, #tpu.memory_space<vmem>>, vector<32x32xf32>
    %cst_29 = arith.constant dense<0.000000e+00> : vector<8x32xf32>
    %58 = tpu.matmul %56, %57, %cst_29 {dimension_numbers = #tpu.dot_dimension_numbers<[1], [0], [0], [1], [0, 0, 1, 1], [], []>} : vector<8x32xf32>, vector<32x32xf32>, vector<8x32xf32> -> vector<8x32xf32>
    %c0_30 = arith.constant 0 : index
    %c0_31 = arith.constant 0 : index
    %59 = vector.load %arg9[%c0_30, %c0_31] : memref<32x32xf32, #tpu.memory_space<vmem>>, vector<32x32xf32>
    %cst_32 = arith.constant dense<0.000000e+00> : vector<8x32xf32>
    %60 = tpu.matmul %56, %59, %cst_32 {dimension_numbers = #tpu.dot_dimension_numbers<[1], [0], [0], [1], [0, 0, 1, 1], [], []>} : vector<8x32xf32>, vector<32x32xf32>, vector<8x32xf32> -> vector<8x32xf32>
    %cst_33 = arith.constant dense<0.000000e+00> : vector<32xf32>
    %61 = vector.multi_reduction <add>, %58, %cst_33 [0] : vector<8x32xf32> to vector<32xf32>
    %62 = vector.shape_cast %61 : vector<32xf32> to vector<1x32xf32>
    %cst_34 = arith.constant 8.000000e+00 : f32
    %63 = vector.broadcast %cst_34 : f32 to vector<1x32xf32>
    %64 = arith.divf %62, %63 : vector<1x32xf32>
    %65 = vector.broadcast %64 : vector<1x32xf32> to vector<8x32xf32>
    %66 = arith.subf %58, %65 : vector<8x32xf32>
    %67 = arith.mulf %66, %66 : vector<8x32xf32>
    %cst_35 = arith.constant dense<0.000000e+00> : vector<32xf32>
    %68 = vector.multi_reduction <add>, %67, %cst_35 [0] : vector<8x32xf32> to vector<32xf32>
    %69 = vector.shape_cast %68 : vector<32xf32> to vector<1x32xf32>
    %cst_36 = arith.constant 8.000000e+00 : f32
    %70 = vector.broadcast %cst_36 : f32 to vector<1x32xf32>
    %71 = arith.divf %69, %70 : vector<1x32xf32>
    %cst_37 = arith.constant 9.99999974E-6 : f32
    %72 = vector.broadcast %cst_37 : f32 to vector<1x32xf32>
    %73 = arith.addf %71, %72 : vector<1x32xf32>
    %74 = math.rsqrt %73 : vector<1x32xf32>
    %75 = vector.broadcast %74 : vector<1x32xf32> to vector<8x32xf32>
    %76 = arith.mulf %66, %75 : vector<8x32xf32>
    %c0_38 = arith.constant 0 : index
    %c0_39 = arith.constant 0 : index
    %77 = vector.load %arg10[%c0_38, %c0_39] : memref<1x32xf32, #tpu.memory_space<vmem>>, vector<1x32xf32>
    %78 = vector.broadcast %77 : vector<1x32xf32> to vector<8x32xf32>
    %79 = arith.mulf %76, %78 : vector<8x32xf32>
    %c0_40 = arith.constant 0 : index
    %c0_41 = arith.constant 0 : index
    %80 = vector.load %arg12[%c0_40, %c0_41] : memref<1x32xf32, #tpu.memory_space<vmem>>, vector<1x32xf32>
    %81 = vector.broadcast %80 : vector<1x32xf32> to vector<8x32xf32>
    %82 = arith.addf %79, %81 : vector<8x32xf32>
    %cst_42 = arith.constant dense<0.000000e+00> : vector<32xf32>
    %83 = vector.multi_reduction <add>, %60, %cst_42 [0] : vector<8x32xf32> to vector<32xf32>
    %84 = vector.shape_cast %83 : vector<32xf32> to vector<1x32xf32>
    %cst_43 = arith.constant 8.000000e+00 : f32
    %85 = vector.broadcast %cst_43 : f32 to vector<1x32xf32>
    %86 = arith.divf %84, %85 : vector<1x32xf32>
    %87 = vector.broadcast %86 : vector<1x32xf32> to vector<8x32xf32>
    %88 = arith.subf %60, %87 : vector<8x32xf32>
    %89 = arith.mulf %88, %88 : vector<8x32xf32>
    %cst_44 = arith.constant dense<0.000000e+00> : vector<32xf32>
    %90 = vector.multi_reduction <add>, %89, %cst_44 [0] : vector<8x32xf32> to vector<32xf32>
    %91 = vector.shape_cast %90 : vector<32xf32> to vector<1x32xf32>
    %cst_45 = arith.constant 8.000000e+00 : f32
    %92 = vector.broadcast %cst_45 : f32 to vector<1x32xf32>
    %93 = arith.divf %91, %92 : vector<1x32xf32>
    %cst_46 = arith.constant 9.99999974E-6 : f32
    %94 = vector.broadcast %cst_46 : f32 to vector<1x32xf32>
    %95 = arith.addf %93, %94 : vector<1x32xf32>
    %96 = math.rsqrt %95 : vector<1x32xf32>
    %97 = vector.broadcast %96 : vector<1x32xf32> to vector<8x32xf32>
    %98 = arith.mulf %88, %97 : vector<8x32xf32>
    %c0_47 = arith.constant 0 : index
    %c0_48 = arith.constant 0 : index
    %99 = vector.load %arg11[%c0_47, %c0_48] : memref<1x32xf32, #tpu.memory_space<vmem>>, vector<1x32xf32>
    %100 = vector.broadcast %99 : vector<1x32xf32> to vector<8x32xf32>
    %101 = arith.mulf %98, %100 : vector<8x32xf32>
    %c0_49 = arith.constant 0 : index
    %c0_50 = arith.constant 0 : index
    %102 = vector.load %arg13[%c0_49, %c0_50] : memref<1x32xf32, #tpu.memory_space<vmem>>, vector<1x32xf32>
    %103 = vector.broadcast %102 : vector<1x32xf32> to vector<8x32xf32>
    %104 = arith.addf %101, %103 : vector<8x32xf32>
    %cst_51 = arith.constant 0.000000e+00 : f32
    %105 = vector.broadcast %cst_51 : f32 to vector<8x32xf32>
    %106 = arith.subf %105, %104 : vector<8x32xf32>
    %107 = math.exp %106 : vector<8x32xf32>
    %cst_52 = arith.constant 1.000000e+00 : f32
    %108 = vector.broadcast %cst_52 : f32 to vector<8x32xf32>
    %109 = arith.addf %108, %107 : vector<8x32xf32>
    %cst_53 = arith.constant 1.000000e+00 : f32
    %110 = vector.broadcast %cst_53 : f32 to vector<8x32xf32>
    %111 = arith.divf %110, %109 : vector<8x32xf32>
    %112 = arith.mulf %82, %111 : vector<8x32xf32>
    %113 = arith.addf %56, %112 : vector<8x32xf32>
    %cst_54 = arith.constant 0.707106769 : f32
    %114 = vector.broadcast %cst_54 : f32 to vector<8x32xf32>
    %115 = arith.mulf %113, %114 : vector<8x32xf32>
    %c0_55 = arith.constant 0 : index
    %c0_56 = arith.constant 0 : index
    %116 = vector.load %arg14[%c0_55, %c0_56] : memref<32x32xf32, #tpu.memory_space<vmem>>, vector<32x32xf32>
    %cst_57 = arith.constant dense<0.000000e+00> : vector<8x32xf32>
    %117 = tpu.matmul %115, %116, %cst_57 {dimension_numbers = #tpu.dot_dimension_numbers<[1], [0], [0], [1], [0, 0, 1, 1], [], []>} : vector<8x32xf32>, vector<32x32xf32>, vector<8x32xf32> -> vector<8x32xf32>
    %c0_58 = arith.constant 0 : index
    %c0_59 = arith.constant 0 : index
    %118 = vector.load %arg15[%c0_58, %c0_59] : memref<32x32xf32, #tpu.memory_space<vmem>>, vector<32x32xf32>
    %cst_60 = arith.constant dense<0.000000e+00> : vector<8x32xf32>
    %119 = tpu.matmul %115, %118, %cst_60 {dimension_numbers = #tpu.dot_dimension_numbers<[1], [0], [0], [1], [0, 0, 1, 1], [], []>} : vector<8x32xf32>, vector<32x32xf32>, vector<8x32xf32> -> vector<8x32xf32>
    %cst_61 = arith.constant dense<0.000000e+00> : vector<32xf32>
    %120 = vector.multi_reduction <add>, %117, %cst_61 [0] : vector<8x32xf32> to vector<32xf32>
    %121 = vector.shape_cast %120 : vector<32xf32> to vector<1x32xf32>
    %cst_62 = arith.constant 8.000000e+00 : f32
    %122 = vector.broadcast %cst_62 : f32 to vector<1x32xf32>
    %123 = arith.divf %121, %122 : vector<1x32xf32>
    %124 = vector.broadcast %123 : vector<1x32xf32> to vector<8x32xf32>
    %125 = arith.subf %117, %124 : vector<8x32xf32>
    %126 = arith.mulf %125, %125 : vector<8x32xf32>
    %cst_63 = arith.constant dense<0.000000e+00> : vector<32xf32>
    %127 = vector.multi_reduction <add>, %126, %cst_63 [0] : vector<8x32xf32> to vector<32xf32>
    %128 = vector.shape_cast %127 : vector<32xf32> to vector<1x32xf32>
    %cst_64 = arith.constant 8.000000e+00 : f32
    %129 = vector.broadcast %cst_64 : f32 to vector<1x32xf32>
    %130 = arith.divf %128, %129 : vector<1x32xf32>
    %cst_65 = arith.constant 9.99999974E-6 : f32
    %131 = vector.broadcast %cst_65 : f32 to vector<1x32xf32>
    %132 = arith.addf %130, %131 : vector<1x32xf32>
    %133 = math.rsqrt %132 : vector<1x32xf32>
    %134 = vector.broadcast %133 : vector<1x32xf32> to vector<8x32xf32>
    %135 = arith.mulf %125, %134 : vector<8x32xf32>
    %c0_66 = arith.constant 0 : index
    %c0_67 = arith.constant 0 : index
    %136 = vector.load %arg16[%c0_66, %c0_67] : memref<1x32xf32, #tpu.memory_space<vmem>>, vector<1x32xf32>
    %137 = vector.broadcast %136 : vector<1x32xf32> to vector<8x32xf32>
    %138 = arith.mulf %135, %137 : vector<8x32xf32>
    %c0_68 = arith.constant 0 : index
    %c0_69 = arith.constant 0 : index
    %139 = vector.load %arg18[%c0_68, %c0_69] : memref<1x32xf32, #tpu.memory_space<vmem>>, vector<1x32xf32>
    %140 = vector.broadcast %139 : vector<1x32xf32> to vector<8x32xf32>
    %141 = arith.addf %138, %140 : vector<8x32xf32>
    %cst_70 = arith.constant dense<0.000000e+00> : vector<32xf32>
    %142 = vector.multi_reduction <add>, %119, %cst_70 [0] : vector<8x32xf32> to vector<32xf32>
    %143 = vector.shape_cast %142 : vector<32xf32> to vector<1x32xf32>
    %cst_71 = arith.constant 8.000000e+00 : f32
    %144 = vector.broadcast %cst_71 : f32 to vector<1x32xf32>
    %145 = arith.divf %143, %144 : vector<1x32xf32>
    %146 = vector.broadcast %145 : vector<1x32xf32> to vector<8x32xf32>
    %147 = arith.subf %119, %146 : vector<8x32xf32>
    %148 = arith.mulf %147, %147 : vector<8x32xf32>
    %cst_72 = arith.constant dense<0.000000e+00> : vector<32xf32>
    %149 = vector.multi_reduction <add>, %148, %cst_72 [0] : vector<8x32xf32> to vector<32xf32>
    %150 = vector.shape_cast %149 : vector<32xf32> to vector<1x32xf32>
    %cst_73 = arith.constant 8.000000e+00 : f32
    %151 = vector.broadcast %cst_73 : f32 to vector<1x32xf32>
    %152 = arith.divf %150, %151 : vector<1x32xf32>
    %cst_74 = arith.constant 9.99999974E-6 : f32
    %153 = vector.broadcast %cst_74 : f32 to vector<1x32xf32>
    %154 = arith.addf %152, %153 : vector<1x32xf32>
    %155 = math.rsqrt %154 : vector<1x32xf32>
    %156 = vector.broadcast %155 : vector<1x32xf32> to vector<8x32xf32>
    %157 = arith.mulf %147, %156 : vector<8x32xf32>
    %c0_75 = arith.constant 0 : index
    %c0_76 = arith.constant 0 : index
    %158 = vector.load %arg17[%c0_75, %c0_76] : memref<1x32xf32, #tpu.memory_space<vmem>>, vector<1x32xf32>
    %159 = vector.broadcast %158 : vector<1x32xf32> to vector<8x32xf32>
    %160 = arith.mulf %157, %159 : vector<8x32xf32>
    %c0_77 = arith.constant 0 : index
    %c0_78 = arith.constant 0 : index
    %161 = vector.load %arg19[%c0_77, %c0_78] : memref<1x32xf32, #tpu.memory_space<vmem>>, vector<1x32xf32>
    %162 = vector.broadcast %161 : vector<1x32xf32> to vector<8x32xf32>
    %163 = arith.addf %160, %162 : vector<8x32xf32>
    %cst_79 = arith.constant 0.000000e+00 : f32
    %164 = vector.broadcast %cst_79 : f32 to vector<8x32xf32>
    %165 = arith.subf %164, %163 : vector<8x32xf32>
    %166 = math.exp %165 : vector<8x32xf32>
    %cst_80 = arith.constant 1.000000e+00 : f32
    %167 = vector.broadcast %cst_80 : f32 to vector<8x32xf32>
    %168 = arith.addf %167, %166 : vector<8x32xf32>
    %cst_81 = arith.constant 1.000000e+00 : f32
    %169 = vector.broadcast %cst_81 : f32 to vector<8x32xf32>
    %170 = arith.divf %169, %168 : vector<8x32xf32>
    %171 = arith.mulf %141, %170 : vector<8x32xf32>
    %172 = arith.addf %115, %171 : vector<8x32xf32>
    %cst_82 = arith.constant 0.707106769 : f32
    %173 = vector.broadcast %cst_82 : f32 to vector<8x32xf32>
    %174 = arith.mulf %172, %173 : vector<8x32xf32>
    %c0_83 = arith.constant 0 : index
    %c0_84 = arith.constant 0 : index
    %175 = vector.load %arg20[%c0_83, %c0_84] : memref<32x32xf32, #tpu.memory_space<vmem>>, vector<32x32xf32>
    %cst_85 = arith.constant dense<0.000000e+00> : vector<8x32xf32>
    %176 = tpu.matmul %174, %175, %cst_85 {dimension_numbers = #tpu.dot_dimension_numbers<[1], [0], [0], [1], [0, 0, 1, 1], [], []>} : vector<8x32xf32>, vector<32x32xf32>, vector<8x32xf32> -> vector<8x32xf32>
    %c0_86 = arith.constant 0 : index
    %c0_87 = arith.constant 0 : index
    %177 = vector.load %arg21[%c0_86, %c0_87] : memref<32x32xf32, #tpu.memory_space<vmem>>, vector<32x32xf32>
    %cst_88 = arith.constant dense<0.000000e+00> : vector<8x32xf32>
    %178 = tpu.matmul %174, %177, %cst_88 {dimension_numbers = #tpu.dot_dimension_numbers<[1], [0], [0], [1], [0, 0, 1, 1], [], []>} : vector<8x32xf32>, vector<32x32xf32>, vector<8x32xf32> -> vector<8x32xf32>
    %cst_89 = arith.constant dense<0.000000e+00> : vector<32xf32>
    %179 = vector.multi_reduction <add>, %176, %cst_89 [0] : vector<8x32xf32> to vector<32xf32>
    %180 = vector.shape_cast %179 : vector<32xf32> to vector<1x32xf32>
    %cst_90 = arith.constant 8.000000e+00 : f32
    %181 = vector.broadcast %cst_90 : f32 to vector<1x32xf32>
    %182 = arith.divf %180, %181 : vector<1x32xf32>
    %183 = vector.broadcast %182 : vector<1x32xf32> to vector<8x32xf32>
    %184 = arith.subf %176, %183 : vector<8x32xf32>
    %185 = arith.mulf %184, %184 : vector<8x32xf32>
    %cst_91 = arith.constant dense<0.000000e+00> : vector<32xf32>
    %186 = vector.multi_reduction <add>, %185, %cst_91 [0] : vector<8x32xf32> to vector<32xf32>
    %187 = vector.shape_cast %186 : vector<32xf32> to vector<1x32xf32>
    %cst_92 = arith.constant 8.000000e+00 : f32
    %188 = vector.broadcast %cst_92 : f32 to vector<1x32xf32>
    %189 = arith.divf %187, %188 : vector<1x32xf32>
    %cst_93 = arith.constant 9.99999974E-6 : f32
    %190 = vector.broadcast %cst_93 : f32 to vector<1x32xf32>
    %191 = arith.addf %189, %190 : vector<1x32xf32>
    %192 = math.rsqrt %191 : vector<1x32xf32>
    %193 = vector.broadcast %192 : vector<1x32xf32> to vector<8x32xf32>
    %194 = arith.mulf %184, %193 : vector<8x32xf32>
    %c0_94 = arith.constant 0 : index
    %c0_95 = arith.constant 0 : index
    %195 = vector.load %arg22[%c0_94, %c0_95] : memref<1x32xf32, #tpu.memory_space<vmem>>, vector<1x32xf32>
    %196 = vector.broadcast %195 : vector<1x32xf32> to vector<8x32xf32>
    %197 = arith.mulf %194, %196 : vector<8x32xf32>
    %c0_96 = arith.constant 0 : index
    %c0_97 = arith.constant 0 : index
    %198 = vector.load %arg24[%c0_96, %c0_97] : memref<1x32xf32, #tpu.memory_space<vmem>>, vector<1x32xf32>
    %199 = vector.broadcast %198 : vector<1x32xf32> to vector<8x32xf32>
    %200 = arith.addf %197, %199 : vector<8x32xf32>
    %cst_98 = arith.constant dense<0.000000e+00> : vector<32xf32>
    %201 = vector.multi_reduction <add>, %178, %cst_98 [0] : vector<8x32xf32> to vector<32xf32>
    %202 = vector.shape_cast %201 : vector<32xf32> to vector<1x32xf32>
    %cst_99 = arith.constant 8.000000e+00 : f32
    %203 = vector.broadcast %cst_99 : f32 to vector<1x32xf32>
    %204 = arith.divf %202, %203 : vector<1x32xf32>
    %205 = vector.broadcast %204 : vector<1x32xf32> to vector<8x32xf32>
    %206 = arith.subf %178, %205 : vector<8x32xf32>
    %207 = arith.mulf %206, %206 : vector<8x32xf32>
    %cst_100 = arith.constant dense<0.000000e+00> : vector<32xf32>
    %208 = vector.multi_reduction <add>, %207, %cst_100 [0] : vector<8x32xf32> to vector<32xf32>
    %209 = vector.shape_cast %208 : vector<32xf32> to vector<1x32xf32>
    %cst_101 = arith.constant 8.000000e+00 : f32
    %210 = vector.broadcast %cst_101 : f32 to vector<1x32xf32>
    %211 = arith.divf %209, %210 : vector<1x32xf32>
    %cst_102 = arith.constant 9.99999974E-6 : f32
    %212 = vector.broadcast %cst_102 : f32 to vector<1x32xf32>
    %213 = arith.addf %211, %212 : vector<1x32xf32>
    %214 = math.rsqrt %213 : vector<1x32xf32>
    %215 = vector.broadcast %214 : vector<1x32xf32> to vector<8x32xf32>
    %216 = arith.mulf %206, %215 : vector<8x32xf32>
    %c0_103 = arith.constant 0 : index
    %c0_104 = arith.constant 0 : index
    %217 = vector.load %arg23[%c0_103, %c0_104] : memref<1x32xf32, #tpu.memory_space<vmem>>, vector<1x32xf32>
    %218 = vector.broadcast %217 : vector<1x32xf32> to vector<8x32xf32>
    %219 = arith.mulf %216, %218 : vector<8x32xf32>
    %c0_105 = arith.constant 0 : index
    %c0_106 = arith.constant 0 : index
    %220 = vector.load %arg25[%c0_105, %c0_106] : memref<1x32xf32, #tpu.memory_space<vmem>>, vector<1x32xf32>
    %221 = vector.broadcast %220 : vector<1x32xf32> to vector<8x32xf32>
    %222 = arith.addf %219, %221 : vector<8x32xf32>
    %cst_107 = arith.constant 0.000000e+00 : f32
    %223 = vector.broadcast %cst_107 : f32 to vector<8x32xf32>
    %224 = arith.subf %223, %222 : vector<8x32xf32>
    %225 = math.exp %224 : vector<8x32xf32>
    %cst_108 = arith.constant 1.000000e+00 : f32
    %226 = vector.broadcast %cst_108 : f32 to vector<8x32xf32>
    %227 = arith.addf %226, %225 : vector<8x32xf32>
    %cst_109 = arith.constant 1.000000e+00 : f32
    %228 = vector.broadcast %cst_109 : f32 to vector<8x32xf32>
    %229 = arith.divf %228, %227 : vector<8x32xf32>
    %230 = arith.mulf %200, %229 : vector<8x32xf32>
    %231 = arith.addf %174, %230 : vector<8x32xf32>
    %cst_110 = arith.constant 0.707106769 : f32
    %232 = vector.broadcast %cst_110 : f32 to vector<8x32xf32>
    %233 = arith.mulf %231, %232 : vector<8x32xf32>
    %c0_111 = arith.constant 0 : index
    %c0_112 = arith.constant 0 : index
    %234 = vector.load %arg26[%c0_111, %c0_112] : memref<8x32xf32, #tpu.memory_space<vmem>>, vector<8x32xf32>
    tpu.vector_store %arg26[%c0_111, %c0_112], %233 {strides = array<i32>} : memref<8x32xf32, #tpu.memory_space<vmem>>, vector<8x32xf32>,
    return
  }
  func.func @transform_0(%arg0: i32) -> (i32, i32) {
    %c0_i32 = arith.constant 0 : i32
    %c0_i32_0 = arith.constant 0 : i32
    return %arg0, %c0_i32 : i32, i32
  }
  func.func @transform_1(%arg0: i32) -> (i32, i32) {
    %c0_i32 = arith.constant 0 : i32
    %c0_i32_0 = arith.constant 0 : i32
    %c0_i32_1 = arith.constant 0 : i32
    return %c0_i32, %c0_i32_0 : i32, i32
  }
  func.func @transform_2(%arg0: i32) -> (i32, i32) {
    %c0_i32 = arith.constant 0 : i32
    %c0_i32_0 = arith.constant 0 : i32
    %c0_i32_1 = arith.constant 0 : i32
    return %c0_i32, %c0_i32_0 : i32, i32
  }
  func.func @transform_3(%arg0: i32) -> (i32, i32) {
    %c0_i32 = arith.constant 0 : i32
    %c0_i32_0 = arith.constant 0 : i32
    %c0_i32_1 = arith.constant 0 : i32
    return %c0_i32, %c0_i32_0 : i32, i32
  }
  func.func @transform_4(%arg0: i32) -> (i32, i32) {
    %c0_i32 = arith.constant 0 : i32
    %c0_i32_0 = arith.constant 0 : i32
    %c0_i32_1 = arith.constant 0 : i32
    return %c0_i32, %c0_i32_0 : i32, i32
  }
  func.func @transform_5(%arg0: i32) -> (i32, i32) {
    %c0_i32 = arith.constant 0 : i32
    %c0_i32_0 = arith.constant 0 : i32
    %c0_i32_1 = arith.constant 0 : i32
    return %c0_i32, %c0_i32_0 : i32, i32
  }
  func.func @transform_6(%arg0: i32) -> (i32, i32) {
    %c0_i32 = arith.constant 0 : i32
    %c0_i32_0 = arith.constant 0 : i32
    %c0_i32_1 = arith.constant 0 : i32
    return %c0_i32, %c0_i32_0 : i32, i32
  }
  func.func @transform_7(%arg0: i32) -> (i32, i32) {
    %c0_i32 = arith.constant 0 : i32
    %c0_i32_0 = arith.constant 0 : i32
    %c0_i32_1 = arith.constant 0 : i32
    return %c0_i32, %c0_i32_0 : i32, i32
  }
  func.func @transform_8(%arg0: i32) -> (i32, i32) {
    %c0_i32 = arith.constant 0 : i32
    %c0_i32_0 = arith.constant 0 : i32
    %c0_i32_1 = arith.constant 0 : i32
    return %c0_i32, %c0_i32_0 : i32, i32
  }
  func.func @transform_9(%arg0: i32) -> (i32, i32) {
    %c0_i32 = arith.constant 0 : i32
    %c0_i32_0 = arith.constant 0 : i32
    %c0_i32_1 = arith.constant 0 : i32
    return %c0_i32, %c0_i32_0 : i32, i32
  }
  func.func @transform_10(%arg0: i32) -> (i32, i32) {
    %c0_i32 = arith.constant 0 : i32
    %c0_i32_0 = arith.constant 0 : i32
    %c0_i32_1 = arith.constant 0 : i32
    return %c0_i32, %c0_i32_0 : i32, i32
  }
  func.func @transform_11(%arg0: i32) -> (i32, i32) {
    %c0_i32 = arith.constant 0 : i32
    %c0_i32_0 = arith.constant 0 : i32
    %c0_i32_1 = arith.constant 0 : i32
    return %c0_i32, %c0_i32_0 : i32, i32
  }
  func.func @transform_12(%arg0: i32) -> (i32, i32) {
    %c0_i32 = arith.constant 0 : i32
    %c0_i32_0 = arith.constant 0 : i32
    %c0_i32_1 = arith.constant 0 : i32
    return %c0_i32, %c0_i32_0 : i32, i32
  }
  func.func @transform_13(%arg0: i32) -> (i32, i32) {
    %c0_i32 = arith.constant 0 : i32
    %c0_i32_0 = arith.constant 0 : i32
    %c0_i32_1 = arith.constant 0 : i32
    return %c0_i32, %c0_i32_0 : i32, i32
  }
  func.func @transform_14(%arg0: i32) -> (i32, i32) {
    %c0_i32 = arith.constant 0 : i32
    %c0_i32_0 = arith.constant 0 : i32
    %c0_i32_1 = arith.constant 0 : i32
    return %c0_i32, %c0_i32_0 : i32, i32
  }
  func.func @transform_15(%arg0: i32) -> (i32, i32) {
    %c0_i32 = arith.constant 0 : i32
    %c0_i32_0 = arith.constant 0 : i32
    %c0_i32_1 = arith.constant 0 : i32
    return %c0_i32, %c0_i32_0 : i32, i32
  }
  func.func @transform_16(%arg0: i32) -> (i32, i32) {
    %c0_i32 = arith.constant 0 : i32
    %c0_i32_0 = arith.constant 0 : i32
    %c0_i32_1 = arith.constant 0 : i32
    return %c0_i32, %c0_i32_0 : i32, i32
  }
  func.func @transform_17(%arg0: i32) -> (i32, i32) {
    %c0_i32 = arith.constant 0 : i32
    %c0_i32_0 = arith.constant 0 : i32
    %c0_i32_1 = arith.constant 0 : i32
    return %c0_i32, %c0_i32_0 : i32, i32
  }
  func.func @transform_18(%arg0: i32) -> (i32, i32) {
    %c0_i32 = arith.constant 0 : i32
    %c0_i32_0 = arith.constant 0 : i32
    %c0_i32_1 = arith.constant 0 : i32
    return %c0_i32, %c0_i32_0 : i32, i32
  }
  func.func @transform_19(%arg0: i32) -> (i32, i32) {
    %c0_i32 = arith.constant 0 : i32
    %c0_i32_0 = arith.constant 0 : i32
    %c0_i32_1 = arith.constant 0 : i32
    return %c0_i32, %c0_i32_0 : i32, i32
  }
  func.func @transform_20(%arg0: i32) -> (i32, i32) {
    %c0_i32 = arith.constant 0 : i32
    %c0_i32_0 = arith.constant 0 : i32
    %c0_i32_1 = arith.constant 0 : i32
    return %c0_i32, %c0_i32_0 : i32, i32
  }
  func.func @transform_21(%arg0: i32) -> (i32, i32) {
    %c0_i32 = arith.constant 0 : i32
    %c0_i32_0 = arith.constant 0 : i32
    %c0_i32_1 = arith.constant 0 : i32
    return %c0_i32, %c0_i32_0 : i32, i32
  }
  func.func @transform_22(%arg0: i32) -> (i32, i32) {
    %c0_i32 = arith.constant 0 : i32
    %c0_i32_0 = arith.constant 0 : i32
    %c0_i32_1 = arith.constant 0 : i32
    return %c0_i32, %c0_i32_0 : i32, i32
  }
  func.func @transform_23(%arg0: i32) -> (i32, i32) {
    %c0_i32 = arith.constant 0 : i32
    %c0_i32_0 = arith.constant 0 : i32
    %c0_i32_1 = arith.constant 0 : i32
    return %c0_i32, %c0_i32_0 : i32, i32
  }
  func.func @transform_24(%arg0: i32) -> (i32, i32) {
    %c0_i32 = arith.constant 0 : i32
    %c0_i32_0 = arith.constant 0 : i32
    %c0_i32_1 = arith.constant 0 : i32
    return %c0_i32, %c0_i32_0 : i32, i32
  }
  func.func @transform_25(%arg0: i32) -> (i32, i32) {
    %c0_i32 = arith.constant 0 : i32
    %c0_i32_0 = arith.constant 0 : i32
    return %arg0, %c0_i32 : i32, i32
  }
}

</mosaic_0001>

<bundles_post_ra>
// kernel: tpu_custom_call.1
= control target key start
LH: loop header
LB: loop body
LE: loop exit
PB: predicated region body
PF: predicated region fallthrough
CT: control target
= control target key end

     0   :  { %s4112_s0 = inlined_call_operand.hbm [shape: f32[16,24], index: 0, kind: input, shape index: {}]   ;;  %s4113_s1 = inlined_call_operand.hbm [shape: f32[24,32], index: 1, kind: input, shape index: {}]   ;;  %s4114_s2 = inlined_call_operand.hbm [shape: f32[24,32], index: 2, kind: input, shape index: {}]   ;;  %s4115_s3 = inlined_call_operand.hbm [shape: f32[1,32], index: 3, kind: input, shape index: {}]   ;;  %s4116_s4 = inlined_call_operand.hbm [shape: f32[1,32], index: 4, kind: input, shape index: {}]   ;;  %s4117_s5 = inlined_call_operand.hbm [shape: f32[1,32], index: 5, kind: input, shape index: {}]   ;;  %s4118_s6 = inlined_call_operand.hbm [shape: f32[1,32], index: 6, kind: input, shape index: {}]   ;;  %s4119_s7 = inlined_call_operand.hbm [shape: f32[32,32], index: 7, kind: input, shape index: {}]   ;;  %s4120_s8 = inlined_call_operand.hbm [shape: f32[32,32], index: 8, kind: input, shape index: {}]   ;;  %s4121_s9 = inlined_call_operand.hbm [shape: f32[1,32], index: 9, kind: input, shape index: {}]   ;;  %s4122_s10 = inlined_call_operand.hbm [shape: f32[1,32], index: 10, kind: input, shape index: {}]   ;;  %s4123_s11 = inlined_call_operand.hbm [shape: f32[1,32], index: 11, kind: input, shape index: {}]   ;;  %s4124_s12 = inlined_call_operand.hbm [shape: f32[1,32], index: 12, kind: input, shape index: {}]   ;;  %s4125_s13 = inlined_call_operand.vmem [shape: f32[32,32], index: 13, kind: input, shape index: {}]   ;;  %s4126_s14 = inlined_call_operand.hbm [shape: f32[32,32], index: 14, kind: input, shape index: {}]   ;;  %s4127_s15 = inlined_call_operand.hbm [shape: f32[1,32], index: 15, kind: input, shape index: {}]   ;;  %s4128_s16 = inlined_call_operand.hbm [shape: f32[1,32], index: 16, kind: input, shape index: {}]   ;;  %s4129_s17 = inlined_call_operand.hbm [shape: f32[1,32], index: 17, kind: input, shape index: {}]   ;;  %s4130_s18 = inlined_call_operand.vmem [shape: f32[1,32], index: 18, kind: input, shape index: {}]   ;;  %s4131_s19 = inlined_call_operand.vmem [shape: f32[32,32], index: 19, kind: input, shape index: {}]   ;;  %s4132_s20 = inlined_call_operand.hbm [shape: f32[32,32], index: 20, kind: input, shape index: {}]   ;;  %s4133_s21 = inlined_call_operand.vmem [shape: f32[1,32], index: 21, kind: input, shape index: {}]   ;;  %s4134_s22 = inlined_call_operand.vmem [shape: f32[1,32], index: 22, kind: input, shape index: {}]   ;;  %s4135_s23 = inlined_call_operand.vmem [shape: f32[1,32], index: 23, kind: input, shape index: {}]   ;;  %s4136_s24 = inlined_call_operand.vmem [shape: f32[1,32], index: 24, kind: input, shape index: {}]   ;;  %s4137_s25 = inlined_call_operand.hbm [shape: f32[16,32], index: 25, kind: output, shape index: {}]  }
   0x1   :  { %4167 = sst [smem:[#allocation44_spill]] %s4112_s0 }
   0x2   :  { %4168 = sst [smem:[#allocation45_spill]] %s4113_s1 }
   0x3   :  { %4169 = sst [smem:[#allocation46_spill]] %s4114_s2 }
   0x4   :  { %4170 = sst [smem:[#allocation47_spill]] %s4115_s3 }
   0x5   :  { %4171 = sst [smem:[#allocation48_spill]] %s4116_s4 }
   0x6   :  { %4172 = sst [smem:[#allocation49_spill]] %s4117_s5 }
   0x7   :  { %4173 = sst [smem:[#allocation50_spill]] %s4118_s6 }
   0x8   :  { %4174 = sst [smem:[#allocation51_spill]] %s4119_s7 }
   0x9   :  { %4175 = sst [smem:[#allocation52_spill]] %s4120_s8 }
   0xa   :  { %4176 = sst [smem:[#allocation53_spill]] %s4121_s9 }
   0xb   :  { %4177 = sst [smem:[#allocation54_spill]] %s4122_s10 }
   0xc   :  { %4178 = sst [smem:[#allocation55_spill]] %s4123_s11 }
   0xd   :  { %4179 = sst [smem:[#allocation56_spill]] %s4125_s13 }
   0xe   :  { %4180 = sst [smem:[#allocation57_spill]] %s4126_s14 }
   0xf   :  { %4181 = sst [smem:[#allocation58_spill]] %s4130_s18 }
  0x10   :  { %4182 = sst [smem:[#allocation59_spill]] %s4131_s19 }
  0x11   :  { %4183 = sst [smem:[#allocation60_spill]] %s4133_s21 }
  0x12   :  { %4184 = sst [smem:[#allocation61_spill]] %s4134_s22 }
  0x13   :  { %4185 = sst [smem:[#allocation62_spill]] %s4135_s23 }
  0x14   :  { %4186 = sst [smem:[#allocation63_spill]] %s4136_s24 }
  0x15   :  { %4187 = sst [smem:[#allocation64_spill]] %s4137_s25 }
  0x16   :  { %30 = vsyncpa [#allocation3], 0 }
  0x17   :  { %32 = vsyncpa [#allocation3 + $0x1], 0 }
  0x18   :  { %33 = vsyncpa [#allocation6], 0 }
  0x19   :  { %34 = vsyncpa [#allocation9], 0 }
  0x1a   :  { %35 = vsyncpa [#allocation12], 0 }
  0x1b   :  { %36 = vsyncpa [#allocation15], 0 }
  0x1c   :  { %37 = vsyncpa [#allocation18], 0 }
  0x1d   :  { %38 = vsyncpa [#allocation21], 0 }
  0x1e   :  { %39 = vsyncpa [#allocation24], 0 }
  0x1f   :  { %40 = vsyncpa [#allocation27], 0 }
  0x20   :  { %41 = vsyncpa [#allocation30], 0 }
  0x21   :  { %42 = vsyncpa [#allocation4], 0 }
  0x22   :  { %44 = vsyncpa [#allocation4 + $0x1], 0  ;;  %s3440_s29 = smov 0   ;;  %s3442_s2 = smov 0  }
  0x23   :  { %s3444_s6 = smov 0   ;;  %s3446_s30 = smov 0  }
  0x24 LB: > { %s3286_s7 = smov [#allocation5]   ;;  %s3461_s26 = sadd.s32 4294967295, %s3284_s30   ;;  %s3284_s30 = sphi %s3446_s30, %s4246_s30   ;;  %s3280_s6 = sphi %s3444_s6, %s4245_s6   ;;  %s3276_s2 = sphi %s3442_s2, %s4244_s2   ;;  %s3272_s29 = sphi %s3440_s29, %s4243_s29  }
  0x25   : > { %s623_s3 = sshll.u32 %s3286_s7, 4  ;;  %p2189_p0 = scmp.ge.s32.totalorder %s3284_s30, 1  ;;  %s3466_s3 = int_to_ptr.vmem [resolvable:$true] %s623_s3 }
  0x26   : > { %p4157_p1 = scmp.eq.s32.totalorder %s3461_s26, 0  ;;  %p611_p2 = scmp.lt.s32.totalorder %s3284_s30, 3 }
  0x27   : > { %s3287_s8 = smov [#allocation8]   ;;  %s3288_s28 = smov [#allocation11]  }
  0x28   : > { %p3468_p3 = pnand %p2189_p0, %p611_p2  ;;  %s650_s27 = sshll.u32 %s3287_s8, 4  ;;  %s3481_s27 = int_to_ptr.vmem [resolvable:$true] %s650_s27 }
  0x29   : > { %s672_s9 = sshll.u32 %s3288_s28, 4  ;;  %s4191_s7 = sld [smem:[#allocation45_spill]]  ;;  %s3483_s9 = int_to_ptr.vmem [resolvable:$true] %s672_s9 }
  0x2a   : > { %s4188_s1 = scalar_select %p3468_p3, 1, 0 }
  0x2b   : > { %p2494_p5 = pneg %p3468_p3 }
  0x2c   : > { %4189 = sst [smem:[#allocation43_spill]] %s4188_s1 }
  0x2d   : > { %p3477_p6 = pnand %p2494_p5, %p4157_p1 }
  0x2f   : > { %s2676_s25 = scalar_lea.hbm %s4191_s7, 384  ;;  %p3493_p8 = pneg %p3477_p6 }
  0x30   : > { %p2677_p7 = scmp.ne.s32.totalorder %s4191_s7, %s2676_s25  ;;  %p2683_p11 = scmp.lt.u32.totalorder %s2676_s25, %s4191_s7 }
  0x32   : > { %p2679_p9 = pnand %p3493_p8, %p2677_p7 }
  0x34   : > { %p2680_p10 = pneg %p2679_p9 }
  0x36   : > { %p2685_p12 = pnand %p2683_p11, %p2680_p10 }
  0x38   : > { %2688 = shalt.err (!%p2685_p12)
}
  0x39   : > { %s2689_s21 = scalar_lea.vmem %s3466_s3, 384  ;;  %p2697_p5 = scmp.lt.s32.totalorder %s3466_s3, %s3466_s3 }
  0x3a   : > { %p2690_p13 = scmp.ne.s32.totalorder %s3466_s3, %s2689_s21  ;;  %p2698_p4 = scmp.lt.s32.totalorder %s2689_s21, %s2689_s21 }
  0x3c   : > { %p2692_p0 = pnand %p2690_p13, %p3493_p8  ;;  %p2699_p7 = por %p2698_p4, %p2697_p5 }
  0x3e   : > { %p2693_p2 = pneg %p2692_p0 }
  0x40   : > { %p2700_p9 = pnand %p2699_p7, %p2693_p2 }
  0x42   : > { %2703 = shalt.err (!%p2700_p9)
}
  0x43   : > { %s4152_s23 = smov 128   ;;  %s4154_s24 = smov 8  }
  0x44   : > { %2497 = dma.hbm_to_vmem [thread:$0]  (!%p3477_p6), %s4191_s7, 384, %s3466_s3, [#allocation6], %s4152_s23, %s4152_s23, %s4154_s24  }
  0x45   : > { %s4193_s22 = sld [smem:[#allocation47_spill]] }
  0x4b   : > { %s2704_s21 = scalar_lea.hbm %s4193_s22, 16 }
  0x4c   : > { %p2705_p4 = scmp.ne.s32.totalorder %s4193_s22, %s2704_s21  ;;  %p2711_p12 = scmp.lt.u32.totalorder %s2704_s21, %s4193_s22 }
  0x4e   : > { %p2707_p10 = pnand %p2705_p4, %p3493_p8 }
  0x50   : > { %p2708_p11 = pneg %p2707_p10 }
  0x52   : > { %p2713_p13 = pnand %p2711_p12, %p2708_p11 }
  0x54   : > { %2716 = shalt.err (!%p2713_p13)
}
  0x55   : > { %s2717_s3 = scalar_lea.vmem %s3481_s27, 16  ;;  %s2724_s18 = scalar_lea.vmem %s3481_s27, 32 }
  0x56   : > { %p2718_p0 = scmp.ne.s32.totalorder %s3481_s27, %s2717_s3  ;;  %p2725_p7 = scmp.lt.s32.totalorder %s3481_s27, %s3481_s27 }
  0x57   : > { %p2726_p9 = scmp.lt.s32.totalorder %s2724_s18, %s2717_s3 }
  0x58   : > { %p2720_p2 = pnand %p2718_p0, %p3493_p8 }
  0x59   : > { %p2727_p4 = por %p2726_p9, %p2725_p7 }
  0x5a   : > { %p2721_p5 = pneg %p2720_p2 }
  0x5c   : > { %p2728_p10 = pnand %p2727_p4, %p2721_p5 }
  0x5e   : > { %2731 = shalt.err (!%p2728_p10)
}
  0x5f   : > { %2503 = dma.hbm_to_vmem [thread:$0]  (!%p3477_p6), %s4193_s22, 16, %s3481_s27, [#allocation9]  }
  0x60   : > { %s4194_s5 = sld [smem:[#allocation49_spill]] }
  0x66   : > { %s2732_s0 = scalar_lea.hbm %s4194_s5, 16 }
  0x67   : > { %p2733_p11 = scmp.ne.s32.totalorder %s4194_s5, %s2732_s0  ;;  %p2739_p0 = scmp.lt.u32.totalorder %s2732_s0, %s4194_s5 }
  0x69   : > { %p2735_p12 = pnand %p2733_p11, %p3493_p8 }
  0x6b   : > { %p2736_p13 = pneg %p2735_p12 }
  0x6d   : > { %p2741_p2 = pnand %p2739_p0, %p2736_p13 }
  0x6f   : > { %2744 = shalt.err (!%p2741_p2)
}
  0x70   : > { %s2745_s27 = scalar_lea.vmem %s3483_s9, 16  ;;  %s2752_s13 = scalar_lea.vmem %s3483_s9, 32 }
  0x71   : > { %p2746_p5 = scmp.ne.s32.totalorder %s3483_s9, %s2745_s27  ;;  %p2753_p4 = scmp.lt.s32.totalorder %s3483_s9, %s3483_s9 }
  0x72   : > { %p2754_p10 = scmp.lt.s32.totalorder %s2752_s13, %s2745_s27 }
  0x73   : > { %p2748_p7 = pnand %p2746_p5, %p3493_p8 }
  0x74   : > { %p2755_p11 = por %p2754_p10, %p2753_p4 }
  0x75   : > { %p2749_p9 = pneg %p2748_p7 }
  0x77   : > { %p2756_p12 = pnand %p2755_p11, %p2749_p9 }
  0x79   : > { %2759 = shalt.err (!%p2756_p12)
}
  0x7a   : > { %2509 = dma.hbm_to_vmem [thread:$0]  (!%p3477_p6), %s4194_s5, 16, %s3483_s9, [#allocation12]  }
  0x7b   : > { %s3291_s25 = smov [#allocation14]   ;;  %s3292_s28 = smov [#allocation17]  }
  0x7c   : > { %s693_s0 = sshll.u32 %s3291_s25, 4  ;;  %s720_s21 = sshll.u32 %s3292_s28, 4  ;;  %s694_s0 = int_to_ptr.vmem [resolvable:$true] %s693_s0  ;;  %s721_s21 = int_to_ptr.vmem [resolvable:$true] %s720_s21 }
  0x7d   : > { %s4195_s23 = sld [smem:[#allocation51_spill]] }
  0x83   : > { %s2760_s27 = scalar_lea.hbm %s4195_s23, 512 }
  0x84   : > { %p2761_p13 = scmp.ne.s32.totalorder %s4195_s23, %s2760_s27  ;;  %p2767_p5 = scmp.lt.u32.totalorder %s2760_s27, %s4195_s23 }
  0x86   : > { %p2763_p0 = pnand %p2761_p13, %p3493_p8 }
  0x88   : > { %p2764_p2 = pneg %p2763_p0 }
  0x8a   : > { %p2769_p7 = pnand %p2767_p5, %p2764_p2 }
  0x8c   : > { %2772 = shalt.err (!%p2769_p7)
}
  0x8d   : > { %s2773_s9 = scalar_lea.vmem %s694_s0, 512  ;;  %p2781_p11 = scmp.lt.s32.totalorder %s694_s0, %s694_s0 }
  0x8e   : > { %p2774_p9 = scmp.ne.s32.totalorder %s694_s0, %s2773_s9  ;;  %p2782_p12 = scmp.lt.s32.totalorder %s2773_s9, %s2773_s9 }
  0x90   : > { %p2776_p4 = pnand %p2774_p9, %p3493_p8  ;;  %p2783_p1 = por %p2782_p12, %p2781_p11 }
  0x92   : > { %p2777_p10 = pneg %p2776_p4 }
  0x94   : > { %p2784_p3 = pnand %p2783_p1, %p2777_p10 }
  0x96   : > { %2787 = shalt.err (!%p2784_p3)
}
  0x97   : > { %s4196_s24 = smov 8   ;;  %s4197_s1 = smov 128  }
  0x98   : > { %2515 = dma.hbm_to_vmem [thread:$0]  (!%p3477_p6), %s4195_s23, 512, %s694_s0, [#allocation15], %s4197_s1, %s4197_s1, %s4196_s24  }
  0x99   : > { %s4198_s18 = sld [smem:[#allocation53_spill]] }
  0x9f   : > { %s2788_s27 = scalar_lea.hbm %s4198_s18, 16 }
  0xa0   : > { %p2789_p1 = scmp.ne.s32.totalorder %s4198_s18, %s2788_s27  ;;  %p2795_p0 = scmp.lt.u32.totalorder %s2788_s27, %s4198_s18 }
  0xa2   : > { %p2791_p3 = pnand %p2789_p1, %p3493_p8 }
  0xa4   : > { %p2792_p13 = pneg %p2791_p3 }
  0xa6   : > { %p2797_p2 = pnand %p2795_p0, %p2792_p13 }
  0xa8   : > { %2800 = shalt.err (!%p2797_p2)
}
  0xa9   : > { %s2801_s7 = scalar_lea.vmem %s721_s21, 16  ;;  %s2808_s0 = scalar_lea.vmem %s721_s21, 32 }
  0xaa   : > { %p2802_p5 = scmp.ne.s32.totalorder %s721_s21, %s2801_s7  ;;  %p2809_p4 = scmp.lt.s32.totalorder %s721_s21, %s721_s21 }
  0xab   : > { %p2810_p10 = scmp.lt.s32.totalorder %s2808_s0, %s2801_s7 }
  0xac   : > { %p2804_p7 = pnand %p2802_p5, %p3493_p8 }
  0xad   : > { %p2811_p11 = por %p2810_p10, %p2809_p4 }
  0xae   : > { %p2805_p9 = pneg %p2804_p7 }
  0xb0   : > { %p2812_p12 = pnand %p2811_p11, %p2805_p9 }
  0xb2   : > { %2815 = shalt.err (!%p2812_p12)
}
  0xb3   : > { %2521 = dma.hbm_to_vmem [thread:$0]  (!%p3477_p6), %s4198_s18, 16, %s721_s21, [#allocation18]  }
  0xb4   : > { %s3293_s5 = smov [#allocation20]   ;;  %s3294_s27 = smov [#allocation23]  }
  0xb5   : > { %s742_s3 = sshll.u32 %s3293_s5, 4  ;;  %s766_s13 = sshll.u32 %s3294_s27, 4  ;;  %s743_s3 = int_to_ptr.vmem [resolvable:$true] %s742_s3  ;;  %s767_s13 = int_to_ptr.vmem [resolvable:$true] %s766_s13 }
  0xb6   : > { %s4199_s11 = sld [smem:[#allocation55_spill]] }
  0xbc   : > { %s2816_s22 = scalar_lea.hbm %s4199_s11, 16 }
  0xbd   : > { %p2817_p1 = scmp.ne.s32.totalorder %s4199_s11, %s2816_s22  ;;  %p2823_p0 = scmp.lt.u32.totalorder %s2816_s22, %s4199_s11 }
  0xbf   : > { %p2819_p3 = pnand %p2817_p1, %p3493_p8 }
  0xc1   : > { %p2820_p13 = pneg %p2819_p3 }
  0xc3   : > { %p2825_p2 = pnand %p2823_p0, %p2820_p13 }
  0xc5   : > { %2828 = shalt.err (!%p2825_p2)
}
  0xc6   : > { %s2829_s21 = scalar_lea.vmem %s743_s3, 16  ;;  %s2836_s28 = scalar_lea.vmem %s743_s3, 32 }
  0xc7   : > { %p2830_p5 = scmp.ne.s32.totalorder %s743_s3, %s2829_s21  ;;  %p2837_p4 = scmp.lt.s32.totalorder %s743_s3, %s743_s3 }
  0xc8   : > { %p2838_p10 = scmp.lt.s32.totalorder %s2836_s28, %s2829_s21 }
  0xc9   : > { %p2832_p7 = pnand %p2830_p5, %p3493_p8 }
  0xca   : > { %p2839_p11 = por %p2838_p10, %p2837_p4 }
  0xcb   : > { %p2833_p9 = pneg %p2832_p7 }
  0xcd   : > { %p2840_p12 = pnand %p2839_p11, %p2833_p9 }
  0xcf   : > { %2843 = shalt.err (!%p2840_p12)
}
  0xd0   : > { %2527 = dma.hbm_to_vmem [thread:$0]  (!%p3477_p6), %s4199_s11, 16, %s743_s3, [#allocation21]  }
  0xd1   : > { %s4200_s14 = sld [smem:[#allocation57_spill]] }
  0xd7   : > { %s2844_s19 = scalar_lea.hbm %s4200_s14, 512 }
  0xd8   : > { %p2845_p1 = scmp.ne.s32.totalorder %s4200_s14, %s2844_s19  ;;  %p2851_p0 = scmp.lt.u32.totalorder %s2844_s19, %s4200_s14 }
  0xda   : > { %p2847_p3 = pnand %p2845_p1, %p3493_p8 }
  0xdc   : > { %p2848_p13 = pneg %p2847_p3 }
  0xde   : > { %p2853_p2 = pnand %p2851_p0, %p2848_p13 }
  0xe0   : > { %2856 = shalt.err (!%p2853_p2)
}
  0xe1   : > { %s2857_s21 = scalar_lea.vmem %s767_s13, 512  ;;  %p2865_p4 = scmp.lt.s32.totalorder %s767_s13, %s767_s13 }
  0xe2   : > { %p2858_p5 = scmp.ne.s32.totalorder %s767_s13, %s2857_s21  ;;  %p2866_p10 = scmp.lt.s32.totalorder %s2857_s21, %s2857_s21 }
  0xe4   : > { %p2860_p7 = pnand %p2858_p5, %p3493_p8  ;;  %p2867_p11 = por %p2866_p10, %p2865_p4 }
  0xe6   : > { %p2861_p9 = pneg %p2860_p7 }
  0xe8   : > { %p2868_p12 = pnand %p2867_p11, %p2861_p9 }
  0xea   : > { %2871 = shalt.err (!%p2868_p12)
}
  0xeb   : > { %2533 = dma.hbm_to_vmem [thread:$0]  (!%p3477_p6), %s4200_s14, 512, %s767_s13, [#allocation24], %s4197_s1, %s4197_s1, %s4196_s24  }
  0xec   : > { %s3295_s5 = smov [#allocation26]   ;;  %s3296_s22 = smov [#allocation7]  }
  0xed   : > { %s791_s27 = sshll.u32 %s3295_s5, 4  ;;  %s636_s23 = sshll.u32 %s3296_s22, 4  ;;  %s792_s27 = int_to_ptr.vmem [resolvable:$true] %s791_s27  ;;  %s637_s23 = int_to_ptr.vmem [resolvable:$true] %s636_s23 }
  0xee   : > { %s2872_s7 = scalar_lea.hbm %s4128_s16, 16 }
  0xef   : > { %p2873_p1 = scmp.ne.s32.totalorder %s4128_s16, %s2872_s7  ;;  %p2879_p0 = scmp.lt.u32.totalorder %s2872_s7, %s4128_s16 }
  0xf1   : > { %p2875_p3 = pnand %p2873_p1, %p3493_p8 }
  0xf3   : > { %p2876_p13 = pneg %p2875_p3 }
  0xf5   : > { %p2881_p2 = pnand %p2879_p0, %p2876_p13 }
  0xf7   : > { %2884 = shalt.err (!%p2881_p2)
}
  0xf8   : > { %s2885_s13 = scalar_lea.vmem %s792_s27, 16  ;;  %s2892_s28 = scalar_lea.vmem %s792_s27, 32 }
  0xf9   : > { %p2886_p5 = scmp.ne.s32.totalorder %s792_s27, %s2885_s13  ;;  %p2893_p4 = scmp.lt.s32.totalorder %s792_s27, %s792_s27 }
  0xfa   : > { %p2894_p10 = scmp.lt.s32.totalorder %s2892_s28, %s2885_s13 }
  0xfb   : > { %p2888_p7 = pnand %p2886_p5, %p3493_p8 }
  0xfc   : > { %p2895_p11 = por %p2894_p10, %p2893_p4 }
  0xfd   : > { %p2889_p9 = pneg %p2888_p7 }
  0xff   : > { %p2896_p12 = pnand %p2895_p11, %p2889_p9 }
 0x101   : > { %2899 = shalt.err (!%p2896_p12)
}
 0x102   : > { %2539 = dma.hbm_to_vmem [thread:$0]  (!%p3477_p6), %s4128_s16, 16, %s792_s27, [#allocation27]  }
 0x103   : > { %s4201_s7 = sld [smem:[#allocation46_spill]] }
 0x109   : > { %s2900_s0 = scalar_lea.hbm %s4201_s7, 384 }
 0x10a   : > { %p2901_p1 = scmp.ne.s32.totalorder %s4201_s7, %s2900_s0  ;;  %p2907_p0 = scmp.lt.u32.totalorder %s2900_s0, %s4201_s7 }
 0x10c   : > { %p2903_p3 = pnand %p2901_p1, %p3493_p8 }
 0x10e   : > { %p2904_p13 = pneg %p2903_p3 }
 0x110   : > { %p2909_p2 = pnand %p2907_p0, %p2904_p13 }
 0x112   : > { %2912 = shalt.err (!%p2909_p2)
}
 0x113   : > { %s2913_s28 = scalar_lea.vmem %s637_s23, 384  ;;  %p2921_p4 = scmp.lt.s32.totalorder %s637_s23, %s637_s23 }
 0x114   : > { %p2914_p5 = scmp.ne.s32.totalorder %s637_s23, %s2913_s28  ;;  %p2922_p10 = scmp.lt.s32.totalorder %s2913_s28, %s2913_s28 }
 0x116   : > { %p2916_p7 = pnand %p2914_p5, %p3493_p8  ;;  %p2923_p11 = por %p2922_p10, %p2921_p4 }
 0x118   : > { %p2917_p9 = pneg %p2916_p7 }
 0x11a   : > { %p2924_p12 = pnand %p2923_p11, %p2917_p9 }
 0x11c   : > { %2927 = shalt.err (!%p2924_p12)
}
 0x11d   : > { %2500 = dma.hbm_to_vmem [thread:$0]  (!%p3477_p6), %s4201_s7, 384, %s637_s23, [#allocation6], %s4197_s1, %s4197_s1, %s4196_s24  }
 0x11e   : > { %s3297_s22 = smov [#allocation10]   ;;  %s3298_s9 = smov [#allocation13]  }
 0x11f   : > { %s661_s19 = sshll.u32 %s3297_s22, 4  ;;  %s683_s0 = sshll.u32 %s3298_s9, 4  ;;  %s662_s19 = int_to_ptr.vmem [resolvable:$true] %s661_s19  ;;  %s684_s0 = int_to_ptr.vmem [resolvable:$true] %s683_s0 }
 0x120   : > { %s4202_s3 = sld [smem:[#allocation48_spill]] }
 0x126   : > { %s2928_s13 = scalar_lea.hbm %s4202_s3, 16 }
 0x127   : > { %p2929_p1 = scmp.ne.s32.totalorder %s4202_s3, %s2928_s13  ;;  %p2935_p0 = scmp.lt.u32.totalorder %s2928_s13, %s4202_s3 }
 0x129   : > { %p2931_p3 = pnand %p2929_p1, %p3493_p8 }
 0x12b   : > { %p2932_p13 = pneg %p2931_p3 }
 0x12d   : > { %p2937_p2 = pnand %p2935_p0, %p2932_p13 }
 0x12f   : > { %2940 = shalt.err (!%p2937_p2)
}
 0x130   : > { %s2941_s23 = scalar_lea.vmem %s662_s19, 16  ;;  %s2948_s5 = scalar_lea.vmem %s662_s19, 32 }
 0x131   : > { %p2942_p5 = scmp.ne.s32.totalorder %s662_s19, %s2941_s23  ;;  %p2949_p4 = scmp.lt.s32.totalorder %s662_s19, %s662_s19 }
 0x132   : > { %p2950_p10 = scmp.lt.s32.totalorder %s2948_s5, %s2941_s23 }
 0x133   : > { %p2944_p7 = pnand %p2942_p5, %p3493_p8 }
 0x134   : > { %p2951_p11 = por %p2950_p10, %p2949_p4 }
 0x135   : > { %p2945_p9 = pneg %p2944_p7 }
 0x137   : > { %p2952_p12 = pnand %p2951_p11, %p2945_p9 }
 0x139   : > { %2955 = shalt.err (!%p2952_p12)
}
 0x13a   : > { %2506 = dma.hbm_to_vmem [thread:$0]  (!%p3477_p6), %s4202_s3, 16, %s662_s19, [#allocation9]  }
 0x13b   : > { %s4203_s25 = sld [smem:[#allocation50_spill]] }
 0x141   : > { %s2956_s21 = scalar_lea.hbm %s4203_s25, 16 }
 0x142   : > { %p2957_p1 = scmp.ne.s32.totalorder %s4203_s25, %s2956_s21  ;;  %p2963_p0 = scmp.lt.u32.totalorder %s2956_s21, %s4203_s25 }
 0x144   : > { %p2959_p3 = pnand %p2957_p1, %p3493_p8 }
 0x146   : > { %p2960_p13 = pneg %p2959_p3 }
 0x148   : > { %p2965_p2 = pnand %p2963_p0, %p2960_p13 }
 0x14a   : > { %2968 = shalt.err (!%p2965_p2)
}
 0x14b   : > { %s2969_s5 = scalar_lea.vmem %s684_s0, 16  ;;  %s2976_s19 = scalar_lea.vmem %s684_s0, 32 }
 0x14c   : > { %p2970_p5 = scmp.ne.s32.totalorder %s684_s0, %s2969_s5  ;;  %p2977_p4 = scmp.lt.s32.totalorder %s684_s0, %s684_s0 }
 0x14d   : > { %p2978_p10 = scmp.lt.s32.totalorder %s2976_s19, %s2969_s5 }
 0x14e   : > { %p2972_p7 = pnand %p2970_p5, %p3493_p8 }
 0x14f   : > { %p2979_p11 = por %p2978_p10, %p2977_p4 }
 0x150   : > { %p2973_p9 = pneg %p2972_p7 }
 0x152   : > { %p2980_p12 = pnand %p2979_p11, %p2973_p9 }
 0x154   : > { %2983 = shalt.err (!%p2980_p12)
}
 0x155   : > { %2512 = dma.hbm_to_vmem [thread:$0]  (!%p3477_p6), %s4203_s25, 16, %s684_s0, [#allocation12]  }
 0x156   : > { %s3299_s14 = smov [#allocation16]   ;;  %s3300_s21 = smov [#allocation19]  }
 0x157   : > { %s706_s9 = sshll.u32 %s3299_s14, 4  ;;  %s731_s13 = sshll.u32 %s3300_s21, 4  ;;  %s707_s9 = int_to_ptr.vmem [resolvable:$true] %s706_s9  ;;  %s732_s13 = int_to_ptr.vmem [resolvable:$true] %s731_s13 }
 0x158   : > { %s4204_s23 = sld [smem:[#allocation52_spill]] }
 0x15e   : > { %s2984_s3 = scalar_lea.hbm %s4204_s23, 512 }
 0x15f   : > { %p2985_p1 = scmp.ne.s32.totalorder %s4204_s23, %s2984_s3  ;;  %p2991_p0 = scmp.lt.u32.totalorder %s2984_s3, %s4204_s23 }
 0x161   : > { %p2987_p3 = pnand %p2985_p1, %p3493_p8 }
 0x163   : > { %p2988_p13 = pneg %p2987_p3 }
 0x165   : > { %p2993_p2 = pnand %p2991_p0, %p2988_p13 }
 0x167   : > { %2996 = shalt.err (!%p2993_p2)
}
 0x168   : > { %s2997_s0 = scalar_lea.vmem %s707_s9, 512  ;;  %p3005_p4 = scmp.lt.s32.totalorder %s707_s9, %s707_s9 }
 0x169   : > { %p2998_p5 = scmp.ne.s32.totalorder %s707_s9, %s2997_s0  ;;  %p3006_p10 = scmp.lt.s32.totalorder %s2997_s0, %s2997_s0 }
 0x16b   : > { %p3000_p7 = pnand %p2998_p5, %p3493_p8  ;;  %p3007_p11 = por %p3006_p10, %p3005_p4 }
 0x16d   : > { %p3001_p9 = pneg %p3000_p7 }
 0x16f   : > { %p3008_p12 = pnand %p3007_p11, %p3001_p9 }
 0x171   : > { %3011 = shalt.err (!%p3008_p12)
}
 0x172   : > { %2518 = dma.hbm_to_vmem [thread:$0]  (!%p3477_p6), %s4204_s23, 512, %s707_s9, [#allocation15], %s4197_s1, %s4197_s1, %s4196_s24  }
 0x173   : > { %s4205_s10 = sld [smem:[#allocation54_spill]] }
 0x179   : > { %s3012_s21 = scalar_lea.hbm %s4205_s10, 16 }
 0x17a   : > { %p3013_p1 = scmp.ne.s32.totalorder %s4205_s10, %s3012_s21  ;;  %p3019_p0 = scmp.lt.u32.totalorder %s3012_s21, %s4205_s10 }
 0x17c   : > { %p3015_p3 = pnand %p3013_p1, %p3493_p8 }
 0x17e   : > { %p3016_p13 = pneg %p3015_p3 }
 0x180   : > { %p3021_p2 = pnand %p3019_p0, %p3016_p13 }
 0x182   : > { %3024 = shalt.err (!%p3021_p2)
}
 0x183   : > { %s3025_s11 = scalar_lea.vmem %s732_s13, 16  ;;  %s3032_s9 = scalar_lea.vmem %s732_s13, 32 }
 0x184   : > { %p3026_p5 = scmp.ne.s32.totalorder %s732_s13, %s3025_s11  ;;  %p3033_p4 = scmp.lt.s32.totalorder %s732_s13, %s732_s13 }
 0x185   : > { %p3034_p10 = scmp.lt.s32.totalorder %s3032_s9, %s3025_s11 }
 0x186   : > { %p3028_p7 = pnand %p3026_p5, %p3493_p8 }
 0x187   : > { %p3035_p11 = por %p3034_p10, %p3033_p4 }
 0x188   : > { %p3029_p9 = pneg %p3028_p7 }
 0x18a   : > { %p3036_p12 = pnand %p3035_p11, %p3029_p9 }
 0x18c   : > { %3039 = shalt.err (!%p3036_p12)
}
 0x18d   : > { %2524 = dma.hbm_to_vmem [thread:$0]  (!%p3477_p6), %s4205_s10, 16, %s732_s13, [#allocation18]  }
 0x18e   : > { %s3301_s3 = smov [#allocation22]   ;;  %s3302_s14 = smov [#allocation25]  }
 0x18f   : > { %s753_s22 = sshll.u32 %s3301_s3, 4  ;;  %s780_s21 = sshll.u32 %s3302_s14, 4  ;;  %s754_s22 = int_to_ptr.vmem [resolvable:$true] %s753_s22  ;;  %s781_s21 = int_to_ptr.vmem [resolvable:$true] %s780_s21 }
 0x190   : > { %s3040_s5 = scalar_lea.hbm %s4124_s12, 16 }
 0x191   : > { %p3041_p1 = scmp.ne.s32.totalorder %s4124_s12, %s3040_s5  ;;  %p3047_p0 = scmp.lt.u32.totalorder %s3040_s5, %s4124_s12 }
 0x193   : > { %p3043_p3 = pnand %p3041_p1, %p3493_p8 }
 0x195   : > { %p3044_p13 = pneg %p3043_p3 }
 0x197   : > { %p3049_p2 = pnand %p3047_p0, %p3044_p13 }
 0x199   : > { %3052 = shalt.err (!%p3049_p2)
}
 0x19a   : > { %s3053_s13 = scalar_lea.vmem %s754_s22, 16  ;;  %s3060_s7 = scalar_lea.vmem %s754_s22, 32 }
 0x19b   : > { %p3054_p5 = scmp.ne.s32.totalorder %s754_s22, %s3053_s13  ;;  %p3061_p4 = scmp.lt.s32.totalorder %s754_s22, %s754_s22 }
 0x19c   : > { %p3062_p10 = scmp.lt.s32.totalorder %s3060_s7, %s3053_s13 }
 0x19d   : > { %p3056_p7 = pnand %p3054_p5, %p3493_p8 }
 0x19e   : > { %p3063_p11 = por %p3062_p10, %p3061_p4 }
 0x19f   : > { %p3057_p9 = pneg %p3056_p7 }
 0x1a1   : > { %p3064_p12 = pnand %p3063_p11, %p3057_p9 }
 0x1a3   : > { %3067 = shalt.err (!%p3064_p12)
}
 0x1a4   : > { %2530 = dma.hbm_to_vmem [thread:$0]  (!%p3477_p6), %s4124_s12, 16, %s754_s22, [#allocation21]  }
 0x1a5   : > { %s3068_s5 = scalar_lea.hbm %s4127_s15, 16 }
 0x1a6   : > { %p3069_p1 = scmp.ne.s32.totalorder %s4127_s15, %s3068_s5  ;;  %p3075_p0 = scmp.lt.u32.totalorder %s3068_s5, %s4127_s15 }
 0x1a8   : > { %p3071_p3 = pnand %p3069_p1, %p3493_p8 }
 0x1aa   : > { %p3072_p13 = pneg %p3071_p3 }
 0x1ac   : > { %p3077_p2 = pnand %p3075_p0, %p3072_p13 }
 0x1ae   : > { %3080 = shalt.err (!%p3077_p2)
}
 0x1af   : > { %s3081_s13 = scalar_lea.vmem %s781_s21, 16  ;;  %s3088_s22 = scalar_lea.vmem %s781_s21, 32 }
 0x1b0   : > { %p3082_p5 = scmp.ne.s32.totalorder %s781_s21, %s3081_s13  ;;  %p3089_p4 = scmp.lt.s32.totalorder %s781_s21, %s781_s21 }
 0x1b1   : > { %p3090_p10 = scmp.lt.s32.totalorder %s3088_s22, %s3081_s13 }
 0x1b2   : > { %p3084_p7 = pnand %p3082_p5, %p3493_p8 }
 0x1b3   : > { %p3091_p11 = por %p3090_p10, %p3089_p4 }
 0x1b4   : > { %p3085_p9 = pneg %p3084_p7 }
 0x1b6   : > { %p3092_p12 = pnand %p3091_p11, %p3085_p9 }
 0x1b8   : > { %3095 = shalt.err (!%p3092_p12)
}
 0x1b9   : > { %2536 = dma.hbm_to_vmem [thread:$0]  (!%p3477_p6), %s4127_s15, 16, %s781_s21, [#allocation24]  }
 0x1ba   : > { %s3303_s14 = smov [#allocation28]   ;;  %s3304_s27 = smov [#allocation29]  }
 0x1bb   : > { %s802_s28 = sshll.u32 %s3303_s14, 4  ;;  %s818_s5 = sshll.u32 %s3304_s27, 4  ;;  %s803_s28 = int_to_ptr.vmem [resolvable:$true] %s802_s28  ;;  %s819_s5 = int_to_ptr.vmem [resolvable:$true] %s818_s5 }
 0x1bc   : > { %s3096_s9 = scalar_lea.hbm %s4129_s17, 16 }
 0x1bd   : > { %p3097_p1 = scmp.ne.s32.totalorder %s4129_s17, %s3096_s9  ;;  %p3103_p0 = scmp.lt.u32.totalorder %s3096_s9, %s4129_s17 }
 0x1bf   : > { %p3099_p3 = pnand %p3097_p1, %p3493_p8 }
 0x1c1   : > { %p3100_p13 = pneg %p3099_p3 }
 0x1c3   : > { %p3105_p2 = pnand %p3103_p0, %p3100_p13 }
 0x1c5   : > { %3108 = shalt.err (!%p3105_p2)
}
 0x1c6   : > { %s3109_s21 = scalar_lea.vmem %s803_s28, 16  ;;  %s3116_s3 = scalar_lea.vmem %s803_s28, 32 }
 0x1c7   : > { %p3110_p5 = scmp.ne.s32.totalorder %s803_s28, %s3109_s21  ;;  %p3117_p4 = scmp.lt.s32.totalorder %s803_s28, %s803_s28 }
 0x1c8   : > { %p3118_p10 = scmp.lt.s32.totalorder %s3116_s3, %s3109_s21 }
 0x1c9   : > { %p3112_p7 = pnand %p3110_p5, %p3493_p8 }
 0x1ca   : > { %p3119_p11 = por %p3118_p10, %p3117_p4 }
 0x1cb   : > { %p3113_p9 = pneg %p3112_p7 }
 0x1cd   : > { %p3120_p12 = pnand %p3119_p11, %p3113_p9 }
 0x1cf   : > { %3123 = shalt.err (!%p3120_p12)
}
 0x1d0   : > { %2542 = dma.hbm_to_vmem [thread:$0]  (!%p3477_p6), %s4129_s17, 16, %s803_s28, [#allocation27]  }
 0x1d1   : > { %s3124_s9 = scalar_lea.hbm %s4132_s20, 512 }
 0x1d2   : > { %p3125_p1 = scmp.ne.s32.totalorder %s4132_s20, %s3124_s9  ;;  %p3131_p0 = scmp.lt.u32.totalorder %s3124_s9, %s4132_s20 }
 0x1d4   : > { %p3127_p3 = pnand %p3125_p1, %p3493_p8 }
 0x1d6   : > { %p3128_p13 = pneg %p3127_p3 }
 0x1d8   : > { %p3133_p2 = pnand %p3131_p0, %p3128_p13 }
 0x1da   : > { %3136 = shalt.err (!%p3133_p2)
}
 0x1db   : > { %s3137_s21 = scalar_lea.vmem %s819_s5, 512  ;;  %p3145_p4 = scmp.lt.s32.totalorder %s819_s5, %s819_s5 }
 0x1dc   : > { %p3138_p5 = scmp.ne.s32.totalorder %s819_s5, %s3137_s21  ;;  %p3146_p10 = scmp.lt.s32.totalorder %s3137_s21, %s3137_s21 }
 0x1de   : > { %p3140_p7 = pnand %p3138_p5, %p3493_p8  ;;  %p3147_p11 = por %p3146_p10, %p3145_p4 }
 0x1e0   : > { %p3141_p9 = pneg %p3140_p7 }
 0x1e2   : > { %p3148_p12 = pnand %p3147_p11, %p3141_p9 }
 0x1e4   : > { %3151 = shalt.err (!%p3148_p12)
}
 0x1e5   : > { %2545 = dma.hbm_to_vmem [thread:$0]  (!%p3477_p6), %s4132_s20, 512, %s819_s5, [#allocation30], %s4197_s1, %s4197_s1, %s4196_s24  }
 0x1e6   : > { %s2188_s4 = sadd.s32 4294967294, %s3284_s30   ;;  %s3834_s8 = sadd.s32 1, %s3284_s30  }
 0x1e7   : > { %s57_s14 = sadd.s32 1, %s3280_s6  ;;  %s54_s27 = ssub.s32 %s3284_s30, %s3834_s8 }
 0x1e8   : > { %p64_p8 = scmp.ne.s32.totalorder %s3280_s6, %s3276_s2  ;;  %p55_p1 = scmp.eq.s32.totalorder %s54_s27, 0 }
 0x1e9   : > { %p65_p3 = scmp.eq.s32.totalorder %s3284_s30, 0  ;;  %p70_p13 = scmp.ne.s32.totalorder %s3276_s2, %s3272_s29 }
 0x1ea   : > { %p598_p0 = scmp.eq.s32.totalorder %s3461_s26, 1  ;;  %p4206_p5 = scmp.eq.s32.totalorder %s3461_s26, 0 }
 0x1eb   : > { %s3846_s19 = scalar_select %p55_p1, %s3280_s6, %s57_s14  }
 0x1ec   : > { %p66_p2 = por %p65_p3, %p64_p8  ;;  %p3850_p7 = por %p4206_p5, %p70_p13 }
 0x1ed   : > { %p3854_p6 = por %p598_p0, %p64_p8  ;;  %p604_p9 = scmp.eq.s32.totalorder %s2188_s4, 1 }
 0x1ee   : > { %p2571_p4 = scmp.lt.s32.totalorder %s3284_s30, 2  ;;  %s844_s1 = sand.u32 1, %s3280_s6  }
 0x1ef   : > { %s4208_s24 = scalar_select %p3854_p6, 1, 0 }
 0x1f0   : > { %p3860_p10 = por %p604_p9, %p70_p13  ;;  %s2208_s9 = sshll.u32 %s844_s1, 3 }
 0x1f1   : > { %s2209_s0 = sshll.u32 %s3284_s30, 7  ;;  %s4210_s7 = sld [smem:[#allocation44_spill]] }
 0x1f2   : > { %s4209_s5 = scalar_select %p3860_p10, 1, 0 }
 0x1f3   : > { %s848_s28 = scalar_lea.vmem [#allocation2], %s2208_s9  ;;  %p3870_p11 = pnand %p2571_p4, %p66_p2 }
 0x1f4   : > { %s855_s3 = sshll.u32 %s848_s28, 4  ;;  %s845_s14 = scalar_lea.sflag [#allocation3], %s844_s1  ;;  %s3874_s3 = int_to_ptr.vmem [resolvable:$true] %s855_s3 }
 0x1f5   : > { %p3154_p8 = pneg %p3870_p11 }
 0x1f7   : > { %s3868_s21 = scalar_lea.hbm %s4210_s7, %s2209_s0  ;;  %s3157_s13 = scalar_lea.hbm %s4210_s7, 256 }
 0x1f8   : > { %s3152_s27 = scalar_lea.hbm %s3868_s21, 128  ;;  %p3158_p13 = scmp.lt.u32.totalorder %s3868_s21, %s4210_s7 }
 0x1f9   : > { %p3153_p12 = scmp.ne.s32.totalorder %s3868_s21, %s3152_s27  ;;  %p3159_p0 = scmp.lt.u32.totalorder %s3157_s13, %s3152_s27 }
 0x1fa   : > { %p3161_p5 = scmp.lt.u32.totalorder %s3152_s27, %s3868_s21 }
 0x1fb   : > { %p3155_p1 = pnand %p3154_p8, %p3153_p12  ;;  %p3160_p2 = por %p3159_p0, %p3158_p13 }
 0x1fd   : > { %p3156_p3 = pneg %p3155_p1  ;;  %p3162_p9 = por %p3161_p5, %p3160_p2 }
 0x1ff   : > { %p3163_p4 = pnand %p3162_p9, %p3156_p3 }
 0x201   : > { %3166 = shalt.err (!%p3163_p4)
}
 0x202   : > { %s3167_s1 = scalar_lea.vmem %s3874_s3, 128  ;;  %s3305_s0 = smov [#allocation2]  }
 0x203   : > { %p3168_p12 = scmp.ne.s32.totalorder %s3874_s3, %s3167_s1  ;;  %s3172_s9 = sshll.u32 %s3305_s0, 4  ;;  %s3173_s9 = int_to_ptr.vmem [resolvable:$false] %s3172_s9 }
 0x204   : > { %s3174_s22 = scalar_lea.vmem %s3173_s9, 256  ;;  %p3175_p6 = scmp.lt.s32.totalorder %s3874_s3, %s3173_s9 }
 0x205   : > { %p3170_p1 = pnand %p3168_p12, %p3154_p8  ;;  %p3176_p13 = scmp.lt.s32.totalorder %s3174_s22, %s3167_s1 }
 0x207   : > { %p3171_p10 = pneg %p3170_p1  ;;  %p3177_p0 = por %p3176_p13, %p3175_p6 }
 0x209   : > { %p3178_p2 = pnand %p3177_p0, %p3171_p10 }
 0x20b   : > { %3181 = shalt.err (!%p3178_p2)
}
 0x20c   : > { %2549 = dma.hbm_to_vmem [thread:$0]  (!%p3870_p11), %s3868_s21, 128, %s3874_s3, %s845_s14  }
 0x20d   : > { %s4212_s27 = sld [smem:[#allocation43_spill]] }
 0x213   : > { %p4213_p3 = scmp.ne.s32.totalorder %s4212_s27, 0 }
 0x214   : > { %s3904_s13 = sand.u32 (!%p4213_p3), 1, %s3276_s2  }
 0x215   : > { %864 = sbr.rel (%p4213_p3) target bundleno = 1784 (0x6f8), region = 120  ;;  %s2211_s28 = sshll.u32 (!%p4213_p3), %s3904_s13, 3 }
 0x216   : > { %s867_s1 = scalar_lea.sflag (!%p4213_p3), [#allocation3], %s3904_s13  ;;  %s3910_s0 = scalar_lea.vmem (!%p4213_p3), [#allocation2], %s2211_s28 }
 0x21c   : > { %3227 = dma.done.wait (%p3850_p7), %s867_s1, 128  }
 0x21d   : > { %3229 = vsyncadd (%p3850_p7), %s867_s1, 4294967168  ;;  %p4214_p6 = scmp.eq.s32.totalorder %s3461_s26, 0 }
 0x21f   : > { %3231 = dma.done.wait (%p4214_p6), [#allocation6], 768   ;;  %p4215_p10 = pmov %p4214_p6 }
 0x220   : > { %p4216_p11 = pmov %p4214_p6 }
 0x221   : > { %3233 = vsyncadd (%p4215_p10), [#allocation6], 4294966528 }
 0x222   : > { %3235 = dma.done.wait (%p4216_p11), [#allocation9], 32   ;;  %p4217_p8 = pmov %p4214_p6 }
 0x223   : > { %p4218_p5 = pmov %p4214_p6 }
 0x224   : > { %3237 = vsyncadd (%p4217_p8), [#allocation9], 4294967264 }
 0x225   : > { %3239 = dma.done.wait (%p4218_p5), [#allocation12], 32   ;;  %p4219_p9 = pmov %p4218_p5 }
 0x226   : > { %p4220_p7 = pmov %p4218_p5 }
 0x227   : > { %3241 = vsyncadd (%p4219_p9), [#allocation12], 4294967264 }
 0x228   : > { %3243 = dma.done.wait (%p4220_p7), [#allocation15], 1024   ;;  %p4221_p4 = pmov %p4218_p5 }
 0x22a   : > { %3245 = vsyncadd (%p4221_p4), [#allocation15], 4294966272  ;;  %p4222_p12 = pmov %p4221_p4 }
 0x22b   : > { %p4223_p1 = pmov %p4221_p4 }
 0x22c   : > { %3247 = dma.done.wait (%p4222_p12), [#allocation18], 32  }
 0x22d   : > { %3249 = vsyncadd (%p4223_p1), [#allocation18], 4294967264  ;;  %p4224_p13 = pmov %p4223_p1 }
 0x22e   : > { %p4225_p0 = pmov %p4223_p1 }
 0x22f   : > { %3251 = dma.done.wait (%p4224_p13), [#allocation21], 32  }
 0x230   : > { %3253 = vsyncadd (%p4225_p0), [#allocation21], 4294967264  ;;  %p4226_p2 = pmov %p4225_p0 }
 0x231   : > { %p4227_p3 = pmov %p4225_p0 }
 0x232   : > { %3255 = dma.done.wait (%p4226_p2), [#allocation24], 528  }
 0x233   : > { %3257 = vsyncadd (%p4227_p3), [#allocation24], 4294966768  ;;  %p4228_p6 = pmov %p4225_p0 }
 0x234   : > { %p4229_p10 = pmov %p4225_p0 }
 0x235   : > { %3259 = dma.done.wait (%p4228_p6), [#allocation27], 32  }
 0x236   : > { %3261 = vsyncadd (%p4229_p10), [#allocation27], 4294967264  ;;  %p4230_p11 = pmov %p4225_p0 }
 0x237   : > { %p4231_p8 = pmov %p4225_p0 }
 0x238   : > { %3263 = dma.done.wait (%p4230_p11), [#allocation30], 512  }
 0x239   : > { %3265 = vsyncadd (%p4231_p8), [#allocation30], 4294966784  ;;  %v3306_v0 = vmov 0.0|0.0   ;;  %vm3307_vm0 = vmmov 0   ;;  %v3308_v1 = vmov 0.0   ;;  %v1006_v2 = vld [vmem:[#allocation5] sm:$0xff] }
 0x23a   : > { %2380 = vmatprep.subr.bf16.mxu0 %v3306_v0  ;;  %2383 = vmatprep.subr.bf16.mxu1 %v3306_v0  ;;  %v1007_v3 = vld [vmem:[#allocation5 + $0x8] sm:$0xff]  ;;  %v1083_v4 = vld [vmem:[#allocation7] sm:$0xff]  ;;  %v1084_v6 = vld [vmem:[#allocation7 + $0x8] sm:$0xff]  ;;  %vm1009_vm1 = vcmask 195584   ;;  %vm1156_vm2 = vcmask 261120   ;;  %s4232_s3 = sld [smem:[#allocation56_spill]] }
 0x23b   : > { %2302 = vmatprep.mubr.msk.f32.mxu0 %vm3307_vm0, %v3308_v1  ;;  %2311 = vmatprep.mubr.msk.f32.mxu1 %vm3307_vm0, %v3308_v1  ;;  %v2381_v5 = vpack.c.bf16 %v1007_v3, %v1006_v2  ;;  %v2384_v7 = vpack.c.bf16 %v1084_v6, %v1083_v4  ;;  %v1008_v8 = vld [vmem:[#allocation5 + $0x10] sm:$0xff]  ;;  %v1085_v9 = vld [vmem:[#allocation7 + $0x10] sm:$0xff]  ;;  %v1239_v11 = vld [vmem:[#allocation14] sm:$0xff]  ;;  %s4233_s21 = sld [smem:[#allocation59_spill]]  ;;  %s4234_s4 = sld [smem:[#allocation58_spill]] }
 0x23c   : > { %v1005_v10 = vld [vmem:[%s3910_s0] sm:$0xff]  ;;  %v1240_v12 = vld [vmem:[#allocation14 + $0x8] sm:$0xff]  ;;  %v1241_v16 = vld [vmem:[#allocation14 + $0x10] sm:$0xff]  ;;  %s4235_s22 = sld [smem:[#allocation61_spill]]  ;;  %s4236_s0 = sld [smem:[#allocation63_spill]] }
 0x23d   : > { %2382 = vmatpush3.bf16.msra.mxu0 %v2381_v5  ;;  %2385 = vmatpush3.bf16.msra.mxu1 %v2384_v7  ;;  %v1316_v13 = vld [vmem:[#allocation16] sm:$0xff]  ;;  %v2387_v14 = vpack.c.bf16 %v1240_v12, %v1239_v11  ;;  %v1317_v15 = vld [vmem:[#allocation16 + $0x8] sm:$0xff]  ;;  %v1242_v17 = vld [vmem:[#allocation14 + $0x18] sm:$0xff]  ;;  %s4237_s14 = sld [smem:[#allocation60_spill]]  ;;  %s4238_s27 = sld [smem:[#allocation62_spill]] }
 0x23e   : > { %2300 = vmatprep.subr.mxu0 %v3308_v1  ;;  %2309 = vmatprep.subr.mxu1 %v3308_v1  ;;  %v2393_v18 = vpack.c.bf16 %v1317_v15, %v1316_v13  ;;  %v1318_v19 = vld [vmem:[#allocation16 + $0x10] sm:$0xff]  ;;  %v1319_v20 = vld [vmem:[#allocation16 + $0x18] sm:$0xff]  ;;  %v2390_v21 = vpack.c.bf16 %v1242_v17, %v1241_v16  ;;  %s2255_s1 = sshll.u32 %s3461_s26, 7  ;;  %s4239_s11 = sld [smem:[#allocation64_spill]] }
 0x23f   : > { %v2396_v22 = vpack.c.bf16 %v1319_v20, %v1318_v19  ;;  %v2234_v2 = vld [vmem:[#allocation10] ss:$0 sm:$0xff]  ;;  %v2235_v4 = vld [vmem:[#allocation13] ss:$0 sm:$0xff]  ;;  %v2232_v15 = vld [vmem:[#allocation8] ss:$0 sm:$0xff] }
 0x240   : > { %v2233_v17 = vld [vmem:[#allocation11] ss:$0 sm:$0xff]  ;;  %p4240_p9 = scmp.ne.s32.totalorder %s4208_s24, 0 }
 0x241   : > { %2301 = vmatpush3.msra.mxu0 %v1008_v8  ;;  %2310 = vmatpush3.msra.mxu1 %v1085_v9 }
 0x242   : > { %2303 = vmatmul.mubr.msk.f32.vlgmr.msra.gmra.mrb[0].mxu0 %vm1009_vm1, %v1005_v10  ;;  %2312 = vmatmul.mubr.msk.f32.vlgmr.msra.gmra.mrb[0].mxu1 %vm1009_vm1, %v1005_v10 }
 0x243   : > { %2386 = vmatprep.subr.bf16.mxu0 %v3306_v0  ;;  %2392 = vmatprep.subr.bf16.mxu1 %v3306_v0 }
 0x244   : > { %2322 = vmatprep.mubr.msk.f32.mxu0 %vm3307_vm0, %v3308_v1  ;;  %2333 = vmatprep.mubr.msk.f32.mxu1 %vm3307_vm0, %v3308_v1 }
 0x245   : > { %2388 = vmatpush3.bf16.msra.mxu0 %v2387_v14  ;;  %2394 = vmatpush3.bf16.msra.mxu1 %v2393_v18 }
 0x246   : > { %2389 = vmatprep.subr.bf16.mxu0 %v3306_v0  ;;  %2395 = vmatprep.subr.bf16.mxu1 %v3306_v0 }
 0x249   : > { %2391 = vmatpush3.bf16.msra.mxu0 %v2390_v21  ;;  %2397 = vmatpush3.bf16.msra.mxu1 %v2396_v22  ;;  %v1473_v21 = vld [vmem:[%s4232_s3] sm:$0xff]  ;;  %v1474_v22 = vld [vmem:[%s4232_s3 + $0x8] sm:$0xff] }
 0x24a   : > { %2398 = vmatprep.subr.bf16.mxu0 %v3306_v0  ;;  %2404 = vmatprep.subr.bf16.mxu1 %v3306_v0 }
 0x315   : > { %v1079_v23 = vpop.f32.mrb[0].mxu0  ;;  %v1152_v25 = vpop.f32.mrb[0].mxu1 }
 0x316   : > { %v1157_v24 = vsel %vm1156_vm2, %v1079_v23, 0.0  ;;  %v2304_v26 = vpop.f32.mrb[1].mxu0  ;;  %v1195_v28 = vsel %vm1156_vm2, %v1152_v25, 0.0  ;;  %v2313_v29 = vpop.f32.mrb[1].mxu1 }
 0x317   : > { %v1158_v27 = vrot.slane %v1157_v24, 4  ;;  %v1196_v30 = vrot.slane %v1195_v28, 4  ;;  %v1475_v26 = vld [vmem:[%s4232_s3 + $0x10] sm:$0xff]  ;;  %v1552_v29 = vld [vmem:[#allocation23 + $0x10] sm:$0xff] }
 0x319   : > { %v1159_v31 = vadd.f32 %v1158_v27, %v1157_v24  ;;  %v1197_v32 = vadd.f32 %v1196_v30, %v1195_v28  ;;  %v2399_v24 = vpack.c.bf16 %v1474_v22, %v1473_v21  ;;  %v1476_v27 = vld [vmem:[%s4232_s3 + $0x18] sm:$0xff]  ;;  %v1553_v30 = vld [vmem:[#allocation23 + $0x18] sm:$0xff] }
 0x31b   : > { %v1160_v33 = vrot.slane %v1159_v31, 2  ;;  %v1198_v34 = vrot.slane %v1197_v32, 2 }
 0x31d   : > { %v1161_v35 = vadd.f32 %v1160_v33, %v1159_v31  ;;  %v1199_v36 = vadd.f32 %v1198_v34, %v1197_v32  ;;  %v2402_v31 = vpack.c.bf16 %v1476_v27, %v1475_v26  ;;  %v2408_v32 = vpack.c.bf16 %v1553_v30, %v1552_v29  ;;  %v2238_v26 = vld [vmem:[#allocation17] ss:$0 sm:$0xff] }
 0x31f   : > { %v1162_v37 = vrot.slane %v1161_v35, 1  ;;  %v1200_v38 = vrot.slane %v1199_v36, 1 }
 0x321   : > { %v1163_v39 = vadd.f32 %v1162_v37, %v1161_v35  ;;  %v1201_v40 = vadd.f32 %v1200_v38, %v1199_v36 }
 0x323   : > { %v1165_v41 = vmul.f32 0.125, %v1163_v39  ;;  %v1202_v42 = vmul.f32 0.125, %v1201_v40 }
 0x325   : > { %v1166_v43 = vsub.f32 %v1079_v23, %v1165_v41  ;;  %v1203_v44 = vsub.f32 %v1152_v25, %v1202_v42  ;;  %v1550_v23 = vld [vmem:[#allocation23] sm:$0xff]  ;;  %v1551_v25 = vld [vmem:[#allocation23 + $0x8] sm:$0xff] }
 0x326   : > { %v2405_v28 = vpack.c.bf16 %v1551_v25, %v1550_v23 }
 0x327   : > { %v1204_v45 = vmul.f32 %v1203_v44, %v1203_v44  ;;  %v1167_v46 = vmul.f32 %v1166_v43, %v1166_v43 }
 0x329   : > { %v1205_v47 = vsel %vm1156_vm2, %v1204_v45, 0.0  ;;  %v1168_v50 = vsel %vm1156_vm2, %v1167_v46, 0.0 }
 0x32a   : > { %v1206_v48 = vrot.slane %v1205_v47, 4  ;;  %v1169_v52 = vrot.slane %v1168_v50, 4 }
 0x32c   : > { %v1207_v49 = vadd.f32 %v1206_v48, %v1205_v47  ;;  %v1170_v55 = vadd.f32 %v1169_v52, %v1168_v50 }
 0x32e   : > { %v1208_v51 = vrot.slane %v1207_v49, 2  ;;  %v1171_v58 = vrot.slane %v1170_v55, 2 }
 0x330   : > { %v1209_v53 = vadd.f32 %v1208_v51, %v1207_v49  ;;  %v1172_v60 = vadd.f32 %v1171_v58, %v1170_v55 }
 0x332   : > { %v1210_v54 = vrot.slane %v1209_v53, 1  ;;  %v1173_v61 = vrot.slane %v1172_v60, 1 }
 0x334   : > { %v1211_v56 = vadd.f32 %v1210_v54, %v1209_v53  ;;  %v1174_v63 = vadd.f32 %v1173_v61, %v1172_v60 }
 0x336   : > { %v1212_v57 = vmul.f32 0.125, %v1211_v56  ;;  %v1175_v6 = vmul.f32 0.125, %v1174_v63 }
 0x338   : > { %v1213_v59 = vadd.f32 1e-05, %v1212_v57  ;;  %v1176_v9 = vadd.f32 1e-05, %v1175_v6 }
 0x33a   : > { %2644 = vrsqrt.f32 %v1213_v59 }
 0x344   : > { %v2645_v62 = vpop.eup %2644 }
 0x345   : > { %v1215_v3 = vmul.f32 %v2645_v62, %v1203_v44 }
 0x347   : > { %v1223_v5 = vmul.f32 %v2234_v2, %v1215_v3 }
 0x349   : > { %v1231_v7 = vadd.f32 %v2235_v4, %v1223_v5 }
 0x34b   : > { %v1232_v8 = vsub.f32 0.0, %v1231_v7 }
 0x34d   : > { %v1233_v10 = vmul.f32 1.442695, %v1232_v8 }
 0x34f   : > { %2646 = vpow2.f32 %v1233_v10 }
 0x350   : > { %2648 = vrsqrt.f32 %v1176_v9 }
 0x359   : > { %v2647_v11 = vpop.eup %2646 }
 0x35a   : > { %v2649_v12 = vpop.eup %2648  ;;  %v1235_v13 = vadd.f32 1.0, %v2647_v11 }
 0x35b   : > { %v1178_v14 = vmul.f32 %v2649_v12, %v1166_v43  ;;  %v2240_v12 = vld [vmem:[#allocation19] ss:$0 sm:$0xff] }
 0x35c   : > { %2650 = vrcp.f32 %v1235_v13 }
 0x35d   : > { %v1186_v16 = vmul.f32 %v2232_v15, %v1178_v14  ;;  %v2241_v14 = vld [vmem:[#allocation22] ss:$0 sm:$0xff] }
 0x35f   : > { %v1194_v18 = vadd.f32 %v2233_v17, %v1186_v16 }
 0x366   : > { %v2651_v19 = vpop.eup %2650 }
 0x367   : > { %v3975_v20 = vmul.f32 %v2651_v19, %v1194_v18 }
 0x369   : > { %2323 = vmatmul.mubr.msk.f32.vlgmr.msra.gmra.mrb[2].mxu0 %vm1156_vm2, %v3975_v20  ;;  %2334 = vmatmul.mubr.msk.f32.vlgmr.msra.gmra.mrb[2].mxu1 %vm1156_vm2, %v3975_v20 }
 0x36a   : > { %2344 = vmatprep.mubr.msk.f32.mxu0 %vm3307_vm0, %v3308_v1  ;;  %2355 = vmatprep.mubr.msk.f32.mxu1 %vm3307_vm0, %v3308_v1 }
 0x36b   : > { %2400 = vmatpush3.bf16.msra.mxu0 %v2399_v24  ;;  %2406 = vmatpush3.bf16.msra.mxu1 %v2405_v28  ;;  %v2239_v28 = vld [vmem:[#allocation20] ss:$0 sm:$0xff] }
 0x36c   : > { %2401 = vmatprep.subr.bf16.mxu0 %v3306_v0  ;;  %2407 = vmatprep.subr.bf16.mxu1 %v3306_v0 }
 0x36f   : > { %2403 = vmatpush3.bf16.msra.mxu0 %v2402_v31  ;;  %2409 = vmatpush3.bf16.msra.mxu1 %v2408_v32 }
 0x370   : > { %2410 = vmatprep.subr.bf16.mxu0 %v3306_v0  ;;  %2416 = vmatprep.subr.bf16.mxu1 %v3306_v0 }
 0x43c   : > { %v1312_v33 = vpop.f32.mrb[2].mxu0  ;;  %v1386_v34 = vpop.f32.mrb[2].mxu1 }
 0x43d   : > { %v1390_v35 = vsel %vm1156_vm2, %v1312_v33, 0.0  ;;  %v1427_v36 = vsel %vm1156_vm2, %v1386_v34, 0.0  ;;  %v2324_v37 = vpop.f32.mrb[3].mxu0  ;;  %v2335_v38 = vpop.f32.mrb[3].mxu1 }
 0x43e   : > { %v1391_v39 = vrot.slane %v1390_v35, 4  ;;  %v1428_v40 = vrot.slane %v1427_v36, 4  ;;  %v1785_v37 = vld [vmem:[#allocation29 + $0x8] sm:$0xff]  ;;  %v1709_v38 = vld [vmem:[%s4233_s21 + $0x10] sm:$0xff] }
 0x440   : > { %v1392_v41 = vadd.f32 %v1391_v39, %v1390_v35  ;;  %v1429_v42 = vadd.f32 %v1428_v40, %v1427_v36  ;;  %v1784_v35 = vld [vmem:[#allocation29] sm:$0xff]  ;;  %v1786_v40 = vld [vmem:[#allocation29 + $0x10] sm:$0xff] }
 0x441   : > { %v1710_v39 = vld [vmem:[%s4233_s21 + $0x18] sm:$0xff] }
 0x442   : > { %v1393_v43 = vrot.slane %v1392_v41, 2  ;;  %v1430_v44 = vrot.slane %v1429_v42, 2 }
 0x444   : > { %v1394_v45 = vadd.f32 %v1393_v43, %v1392_v41  ;;  %v1431_v46 = vadd.f32 %v1430_v44, %v1429_v42  ;;  %v1787_v41 = vld [vmem:[#allocation29 + $0x18] sm:$0xff]  ;;  %v2414_v42 = vpack.c.bf16 %v1710_v39, %v1709_v38 }
 0x445   : > { %v2420_v43 = vpack.c.bf16 %v1787_v41, %v1786_v40  ;;  %v2245_v38 = vld [vmem:[#allocation28] ss:$0 sm:$0xff] }
 0x446   : > { %v1395_v47 = vrot.slane %v1394_v45, 1  ;;  %v1432_v48 = vrot.slane %v1431_v46, 1 }
 0x448   : > { %v1396_v49 = vadd.f32 %v1395_v47, %v1394_v45  ;;  %v1433_v50 = vadd.f32 %v1432_v48, %v1431_v46 }
 0x44a   : > { %v1397_v51 = vmul.f32 0.125, %v1396_v49  ;;  %v1434_v52 = vmul.f32 0.125, %v1433_v50 }
 0x44c   : > { %v1435_v53 = vsub.f32 %v1386_v34, %v1434_v52  ;;  %v1398_v54 = vsub.f32 %v1312_v33, %v1397_v51  ;;  %v1707_v34 = vld [vmem:[%s4233_s21] sm:$0xff] }
 0x44e   : > { %v1436_v55 = vmul.f32 %v1435_v53, %v1435_v53  ;;  %v1399_v57 = vmul.f32 %v1398_v54, %v1398_v54 }
 0x450   : > { %v1437_v56 = vsel %vm1156_vm2, %v1436_v55, 0.0  ;;  %v1400_v60 = vsel %vm1156_vm2, %v1399_v57, 0.0 }
 0x451   : > { %v1438_v58 = vrot.slane %v1437_v56, 4  ;;  %v1401_v63 = vrot.slane %v1400_v60, 4 }
 0x453   : > { %v1439_v59 = vadd.f32 %v1438_v58, %v1437_v56  ;;  %v1402_v4 = vadd.f32 %v1401_v63, %v1400_v60 }
 0x455   : > { %v1440_v61 = vrot.slane %v1439_v59, 2  ;;  %v1403_v7 = vrot.slane %v1402_v4, 2 }
 0x457   : > { %v1441_v62 = vadd.f32 %v1440_v61, %v1439_v59  ;;  %v1404_v8 = vadd.f32 %v1403_v7, %v1402_v4 }
 0x459   : > { %v1442_v2 = vrot.slane %v1441_v62, 1  ;;  %v1405_v9 = vrot.slane %v1404_v8, 1 }
 0x45b   : > { %v1443_v3 = vadd.f32 %v1442_v2, %v1441_v62  ;;  %v1406_v11 = vadd.f32 %v1405_v9, %v1404_v8 }
 0x45d   : > { %v1444_v5 = vmul.f32 0.125, %v1443_v3  ;;  %v1407_v16 = vmul.f32 0.125, %v1406_v11 }
 0x45f   : > { %v1445_v6 = vadd.f32 1e-05, %v1444_v5  ;;  %v1408_v19 = vadd.f32 1e-05, %v1407_v16 }
 0x461   : > { %2652 = vrsqrt.f32 %v1445_v6 }
 0x46b   : > { %v2653_v10 = vpop.eup %2652 }
 0x46c   : > { %v1447_v13 = vmul.f32 %v2653_v10, %v1435_v53 }
 0x46e   : > { %v1455_v15 = vmul.f32 %v2240_v12, %v1447_v13 }
 0x470   : > { %v1463_v17 = vadd.f32 %v2241_v14, %v1455_v15 }
 0x472   : > { %v1464_v18 = vsub.f32 0.0, %v1463_v17 }
 0x474   : > { %v1465_v21 = vmul.f32 1.442695, %v1464_v18 }
 0x476   : > { %2654 = vpow2.f32 %v1465_v21 }
 0x477   : > { %2656 = vrsqrt.f32 %v1408_v19 }
 0x480   : > { %v2655_v22 = vpop.eup %2654 }
 0x481   : > { %v2657_v23 = vpop.eup %2656  ;;  %v1467_v24 = vadd.f32 1.0, %v2655_v22 }
 0x482   : > { %v1410_v25 = vmul.f32 %v2657_v23, %v1398_v54  ;;  %v2246_v23 = vld [vmem:[#allocation26] ss:$0 sm:$0xff] }
 0x483   : > { %2658 = vrcp.f32 %v1467_v24 }
 0x484   : > { %v1418_v27 = vmul.f32 %v2238_v26, %v1410_v25  ;;  %v2247_v25 = vld [vmem:[%s4234_s4] ss:$0 sm:$0xff]  ;;  %s4067_s4 = scalar_lea.hbm %s4239_s11, %s2255_s1 }
 0x486   : > { %v1426_v29 = vadd.f32 %v2239_v28, %v1418_v27 }
 0x48d   : > { %v2659_v30 = vpop.eup %2658 }
 0x48e   : > { %v1470_v31 = vmul.f32 %v2659_v30, %v1426_v29 }
 0x490   : > { %v1471_v32 = vadd.f32 %v1470_v31, %v3975_v20  ;;  %v1708_v20 = vld [vmem:[%s4233_s21 + $0x8] sm:$0xff] }
 0x491   : > { %v2411_v36 = vpack.c.bf16 %v1708_v20, %v1707_v34 }
 0x492   : > { %v4006_v33 = vmul.f32 0.70710677, %v1471_v32 }
 0x494   : > { %2345 = vmatmul.mubr.msk.f32.vlgmr.msra.gmra.mrb[4].mxu0 %vm1156_vm2, %v4006_v33  ;;  %2356 = vmatmul.mubr.msk.f32.vlgmr.msra.gmra.mrb[4].mxu1 %vm1156_vm2, %v4006_v33 }
 0x495   : > { %2366 = vmatprep.mubr.msk.f32.mxu0 %vm3307_vm0, %v3308_v1  ;;  %2377 = vmatprep.mubr.msk.f32.mxu1 %vm3307_vm0, %v3308_v1  ;;  %v2417_v1 = vpack.c.bf16 %v1785_v37, %v1784_v35 }
 0x496   : > { %2412 = vmatpush3.bf16.msra.mxu0 %v2411_v36  ;;  %v2244_v36 = vld [vmem:[#allocation25] ss:$0 sm:$0xff] }
 0x497   : > { %2418 = vmatpush3.bf16.msra.mxu1 %v2417_v1  ;;  %2413 = vmatprep.subr.bf16.mxu0 %v3306_v0 }
 0x498   : > { %2419 = vmatprep.subr.bf16.mxu1 %v3306_v0 }
 0x49a   : > { %2415 = vmatpush3.bf16.msra.mxu0 %v2414_v42 }
 0x49b   : > { %2421 = vmatpush3.bf16.msra.mxu1 %v2420_v43 }
 0x567   : > { %v1546_v44 = vpop.f32.mrb[4].mxu0  ;;  %v1620_v45 = vpop.f32.mrb[4].mxu1 }
 0x568   : > { %v1624_v46 = vsel %vm1156_vm2, %v1546_v44, 0.0  ;;  %v1661_v47 = vsel %vm1156_vm2, %v1620_v45, 0.0  ;;  %v2346_v48 = vpop.f32.mrb[5].mxu0  ;;  %v2357_v49 = vpop.f32.mrb[5].mxu1 }
 0x569   : > { %v1625_v50 = vrot.slane %v1624_v46, 4  ;;  %v1662_v51 = vrot.slane %v1661_v47, 4 }
 0x56b   : > { %v1626_v52 = vadd.f32 %v1625_v50, %v1624_v46  ;;  %v1663_v53 = vadd.f32 %v1662_v51, %v1661_v47 }
 0x56d   : > { %v1627_v54 = vrot.slane %v1626_v52, 2  ;;  %v1664_v55 = vrot.slane %v1663_v53, 2 }
 0x56f   : > { %v1628_v56 = vadd.f32 %v1627_v54, %v1626_v52  ;;  %v1665_v57 = vadd.f32 %v1664_v55, %v1663_v53 }
 0x571   : > { %v1629_v58 = vrot.slane %v1628_v56, 1  ;;  %v1666_v0 = vrot.slane %v1665_v57, 1 }
 0x573   : > { %v1630_v59 = vadd.f32 %v1629_v58, %v1628_v56  ;;  %v1667_v60 = vadd.f32 %v1666_v0, %v1665_v57 }
 0x575   : > { %v1631_v61 = vmul.f32 0.125, %v1630_v59  ;;  %v1668_v62 = vmul.f32 0.125, %v1667_v60 }
 0x577   : > { %v1669_v63 = vsub.f32 %v1620_v45, %v1668_v62  ;;  %v1632_v2 = vsub.f32 %v1546_v44, %v1631_v61 }
 0x579   : > { %v1670_v3 = vmul.f32 %v1669_v63, %v1669_v63  ;;  %v1633_v5 = vmul.f32 %v1632_v2, %v1632_v2 }
 0x57b   : > { %v1671_v4 = vsel %vm1156_vm2, %v1670_v3, 0.0  ;;  %v1634_v8 = vsel %vm1156_vm2, %v1633_v5, 0.0 }
 0x57c   : > { %v1672_v6 = vrot.slane %v1671_v4, 4  ;;  %v1635_v11 = vrot.slane %v1634_v8, 4 }
 0x57e   : > { %v1673_v7 = vadd.f32 %v1672_v6, %v1671_v4  ;;  %v1636_v14 = vadd.f32 %v1635_v11, %v1634_v8 }
 0x580   : > { %v1674_v9 = vrot.slane %v1673_v7, 2  ;;  %v1637_v17 = vrot.slane %v1636_v14, 2 }
 0x582   : > { %v1675_v10 = vadd.f32 %v1674_v9, %v1673_v7  ;;  %v1638_v18 = vadd.f32 %v1637_v17, %v1636_v14 }
 0x584   : > { %v1676_v12 = vrot.slane %v1675_v10, 1  ;;  %v1639_v19 = vrot.slane %v1638_v18, 1 }
 0x586   : > { %v1677_v13 = vadd.f32 %v1676_v12, %v1675_v10  ;;  %v1640_v22 = vadd.f32 %v1639_v19, %v1638_v18 }
 0x588   : > { %v1678_v15 = vmul.f32 0.125, %v1677_v13  ;;  %v1641_v27 = vmul.f32 0.125, %v1640_v22 }
 0x58a   : > { %v1679_v16 = vadd.f32 1e-05, %v1678_v15  ;;  %v1642_v30 = vadd.f32 1e-05, %v1641_v27 }
 0x58c   : > { %2660 = vrsqrt.f32 %v1679_v16 }
 0x596   : > { %v2661_v21 = vpop.eup %2660 }
 0x597   : > { %v1681_v24 = vmul.f32 %v2661_v21, %v1669_v63  ;;  %v2252_v21 = vld [vmem:[%s4235_s22] ss:$0 sm:$0xff] }
 0x599   : > { %v1689_v26 = vmul.f32 %v2246_v23, %v1681_v24  ;;  %v2253_v23 = vld [vmem:[%s4236_s0] ss:$0 sm:$0xff]  ;;  %s1004_s0 = scalar_lea.vmem [#allocation31], %s2211_s28  ;;  %s3309_s28 = smov [#allocation31]  }
 0x59a   : > { %s1956_s3 = sshll.u32 %s1004_s0, 4  ;;  %s3186_s9 = sshll.u32 %s3309_s28, 4  ;;  %s4069_s3 = int_to_ptr.vmem [resolvable:$true] %s1956_s3  ;;  %s3187_s9 = int_to_ptr.vmem [resolvable:$false] %s3186_s9 }
 0x59b   : > { %v1697_v28 = vadd.f32 %v2247_v25, %v1689_v26  ;;  %s3182_s26 = scalar_lea.vmem %s4069_s3, 128  ;;  %s3188_s22 = scalar_lea.vmem %s3187_s9, 256 }
 0x59c   : > { %p3183_p5 = scmp.ne.s32.totalorder %s4069_s3, %s3182_s26  ;;  %p3189_p12 = scmp.lt.s32.totalorder %s4069_s3, %s3187_s9 }
 0x59d   : > { %v1698_v29 = vsub.f32 0.0, %v1697_v28  ;;  %p3190_p1 = scmp.lt.s32.totalorder %s3188_s22, %s3182_s26 }
 0x59e   : > { %p3184_p7 = pnand %p3183_p5, %p4240_p9 }
 0x59f   : > { %v1699_v31 = vmul.f32 1.442695, %v1698_v29  ;;  %p3191_p13 = por %p3190_p1, %p3189_p12 }
 0x5a0   : > { %p3185_p4 = pneg %p3184_p7 }
 0x5a1   : > { %2662 = vpow2.f32 %v1699_v31 }
 0x5a2   : > { %2664 = vrsqrt.f32 %v1642_v30  ;;  %p3192_p0 = pnand %p3191_p13, %p3185_p4 }
 0x5ab   : > { %v2663_v32 = vpop.eup %2662 }
 0x5ac   : > { %v2665_v34 = vpop.eup %2664  ;;  %v1701_v20 = vadd.f32 1.0, %v2663_v32 }
 0x5ad   : > { %v1644_v35 = vmul.f32 %v2665_v34, %v1632_v2 }
 0x5ae   : > { %2666 = vrcp.f32 %v1701_v20  ;;  %v2250_v20 = vld [vmem:[%s4237_s14] ss:$0 sm:$0xff]  ;;  %s1943_s14 = scalar_lea.sflag [#allocation4], %s3904_s13 }
 0x5af   : > { %v1652_v37 = vmul.f32 %v2244_v36, %v1644_v35  ;;  %v2251_v36 = vld [vmem:[%s4238_s27] ss:$0 sm:$0xff] }
 0x5b1   : > { %v1660_v39 = vadd.f32 %v2245_v38, %v1652_v37 }
 0x5b8   : > { %v2667_v1 = vpop.eup %2666 }
 0x5b9   : > { %v1704_v40 = vmul.f32 %v2667_v1, %v1660_v39 }
 0x5bb   : > { %v1705_v41 = vadd.f32 %v1704_v40, %v4006_v33 }
 0x5bd   : > { %v4038_v42 = vmul.f32 0.70710677, %v1705_v41 }
 0x5bf   : > { %2367 = vmatmul.mubr.msk.f32.vlgmr.msra.gmra.mrb[6].mxu0 %vm1156_vm2, %v4038_v42  ;;  %2378 = vmatmul.mubr.msk.f32.vlgmr.msra.gmra.mrb[6].mxu1 %vm1156_vm2, %v4038_v42 }
 0x692   : > { %v1780_v43 = vpop.f32.mrb[6].mxu0  ;;  %v1854_v44 = vpop.f32.mrb[6].mxu1 }
 0x693   : > { %v1858_v45 = vsel %vm1156_vm2, %v1780_v43, 0.0  ;;  %v1895_v46 = vsel %vm1156_vm2, %v1854_v44, 0.0  ;;  %v2368_v47 = vpop.f32.mrb[7].mxu0  ;;  %v2379_v48 = vpop.f32.mrb[7].mxu1 }
 0x694   : > { %v1859_v49 = vrot.slane %v1858_v45, 4  ;;  %v1896_v50 = vrot.slane %v1895_v46, 4 }
 0x696   : > { %v1860_v51 = vadd.f32 %v1859_v49, %v1858_v45  ;;  %v1897_v33 = vadd.f32 %v1896_v50, %v1895_v46 }
 0x698   : > { %v1861_v52 = vrot.slane %v1860_v51, 2  ;;  %v1898_v53 = vrot.slane %v1897_v33, 2 }
 0x69a   : > { %v1862_v54 = vadd.f32 %v1861_v52, %v1860_v51  ;;  %v1899_v55 = vadd.f32 %v1898_v53, %v1897_v33 }
 0x69c   : > { %v1863_v56 = vrot.slane %v1862_v54, 1  ;;  %v1900_v57 = vrot.slane %v1899_v55, 1 }
 0x69e   : > { %v1864_v58 = vadd.f32 %v1863_v56, %v1862_v54  ;;  %v1901_v0 = vadd.f32 %v1900_v57, %v1899_v55 }
 0x6a0   : > { %v1865_v59 = vmul.f32 0.125, %v1864_v58  ;;  %v1902_v60 = vmul.f32 0.125, %v1901_v0 }
 0x6a2   : > { %v1903_v61 = vsub.f32 %v1854_v44, %v1902_v60  ;;  %v1866_v62 = vsub.f32 %v1780_v43, %v1865_v59 }
 0x6a4   : > { %v1904_v63 = vmul.f32 %v1903_v61, %v1903_v61  ;;  %v1867_v3 = vmul.f32 %v1866_v62, %v1866_v62 }
 0x6a6   : > { %v1905_v2 = vsel %vm1156_vm2, %v1904_v63, 0.0  ;;  %v1868_v6 = vsel %vm1156_vm2, %v1867_v3, 0.0 }
 0x6a7   : > { %v1906_v4 = vrot.slane %v1905_v2, 4  ;;  %v1869_v9 = vrot.slane %v1868_v6, 4 }
 0x6a9   : > { %v1907_v5 = vadd.f32 %v1906_v4, %v1905_v2  ;;  %v1870_v12 = vadd.f32 %v1869_v9, %v1868_v6 }
 0x6ab   : > { %v1908_v7 = vrot.slane %v1907_v5, 2  ;;  %v1871_v15 = vrot.slane %v1870_v12, 2 }
 0x6ad   : > { %v1909_v8 = vadd.f32 %v1908_v7, %v1907_v5  ;;  %v1872_v16 = vadd.f32 %v1871_v15, %v1870_v12 }
 0x6af   : > { %v1910_v10 = vrot.slane %v1909_v8, 1  ;;  %v1873_v17 = vrot.slane %v1872_v16, 1 }
 0x6b1   : > { %v1911_v11 = vadd.f32 %v1910_v10, %v1909_v8  ;;  %v1874_v19 = vadd.f32 %v1873_v17, %v1872_v16 }
 0x6b3   : > { %v1912_v13 = vmul.f32 0.125, %v1911_v11  ;;  %v1875_v25 = vmul.f32 0.125, %v1874_v19 }
 0x6b5   : > { %v1913_v14 = vadd.f32 1e-05, %v1912_v13  ;;  %v1876_v28 = vadd.f32 1e-05, %v1875_v25 }
 0x6b7   : > { %2668 = vrsqrt.f32 %v1913_v14 }
 0x6c1   : > { %v2669_v18 = vpop.eup %2668 }
 0x6c2   : > { %v1915_v22 = vmul.f32 %v2669_v18, %v1903_v61 }
 0x6c4   : > { %v1923_v24 = vmul.f32 %v2252_v21, %v1915_v22 }
 0x6c6   : > { %v1931_v26 = vadd.f32 %v2253_v23, %v1923_v24 }
 0x6c8   : > { %v1932_v27 = vsub.f32 0.0, %v1931_v26 }
 0x6ca   : > { %v1933_v29 = vmul.f32 1.442695, %v1932_v27 }
 0x6cc   : > { %2670 = vpow2.f32 %v1933_v29 }
 0x6cd   : > { %2672 = vrsqrt.f32 %v1876_v28 }
 0x6d6   : > { %v2671_v30 = vpop.eup %2670 }
 0x6d7   : > { %v2673_v31 = vpop.eup %2672  ;;  %v1935_v32 = vadd.f32 1.0, %v2671_v30 }
 0x6d8   : > { %v1878_v34 = vmul.f32 %v2673_v31, %v1866_v62 }
 0x6d9   : > { %2674 = vrcp.f32 %v1935_v32 }
 0x6da   : > { %v1886_v35 = vmul.f32 %v2250_v20, %v1878_v34 }
 0x6dc   : > { %v1894_v37 = vadd.f32 %v2251_v36, %v1886_v35 }
 0x6e3   : > { %v2675_v38 = vpop.eup %2674 }
 0x6e4   : > { %v1938_v39 = vmul.f32 %v2675_v38, %v1894_v37 }
 0x6e6   : > { %v1939_v1 = vadd.f32 %v1938_v39, %v4038_v42 }
 0x6e8   : > { %v1940_v40 = vmul.f32 0.70710677, %v1939_v1 }
 0x6ea   : > { %1941 = vst.msk [vmem:[%s1004_s0] sm:$0xff] %vm1156_vm2, %v1940_v40 }
 0x6eb   : > { %3195 = shalt.err (!%p3192_p0)
}
 0x6ec   : > { %s3196_s10 = scalar_lea.hbm %s4067_s4, 128  ;;  %s3200_s27 = scalar_lea.hbm %s4239_s11, 256 }
 0x6ed   : > { %p3197_p2 = scmp.ne.s32.totalorder %s4067_s4, %s3196_s10  ;;  %p3201_p10 = scmp.lt.u32.totalorder %s4067_s4, %s4239_s11 }
 0x6ee   : > { %p3202_p11 = scmp.lt.u32.totalorder %s3200_s27, %s3196_s10  ;;  %p3204_p5 = scmp.lt.u32.totalorder %s3196_s10, %s4067_s4 }
 0x6ef   : > { %p3198_p3 = pnand %p3197_p2, %p4240_p9 }
 0x6f0   : > { %p3203_p8 = por %p3202_p11, %p3201_p10 }
 0x6f1   : > { %p3199_p6 = pneg %p3198_p3 }
 0x6f2   : > { %p3205_p7 = por %p3204_p5, %p3203_p8 }
 0x6f4   : > { %p3206_p4 = pnand %p3205_p7, %p3199_p6 }
 0x6f6   : > { %3209 = shalt.err (!%p3206_p4)
}
 0x6f7   : > { %2492 = dma.vmem_to_hbm [thread:$0]  (%p4240_p9), %s4069_s3, 128, %s4067_s4, %s1943_s14  }
 0x6f8 PF: > { %s1968_s26 = sand.u32 1, %s3272_s29   ;;  %p4241_p12 = scmp.ne.s32.totalorder %s4209_s5, 0 }
 0x6f9   : > { %p4242_p1 = scmp.ge.s32.totalorder %s3284_s30, 2  ;;  %s1969_s28 = scalar_lea.sflag [#allocation4], %s1968_s26 }
 0x6fb   : > { %p2551_p13 = pnand %p4242_p1, %p4241_p12 }
 0x6fd   : > { %3267 = dma.done.wait (!%p2551_p13), %s1969_s28, 128  }
 0x6fe   : > { %3269 = vsyncadd (!%p2551_p13), %s1969_s28, 4294967168  ;;  %p47_p0 = scmp.ge.s32.totalorder %s3834_s8, 4   ;;  %s4243_s29 = smov %s3276_s2 }
 0x6ff   : > { %s4244_s2 = smov %s3280_s6  ;;  %s4245_s6 = smov %s3846_s19 }
 0x700   : > { %s4246_s30 = smov %s3834_s8  ;;  %49 = sbr.rel (!%p47_p0) target bundleno = 36 (0x24), region = 233 }
 0x707   :  { %1974 = vsyncpa [#allocation3], 1 }
 0x708   :  { %1976 = vsyncpa [#allocation3 + $0x1], 1 }
 0x709   :  { %1977 = vsyncpa [#allocation6], 1 }
 0x70a   :  { %1978 = vsyncpa [#allocation9], 1 }
 0x70b   :  { %1979 = vsyncpa [#allocation12], 1 }
 0x70c   :  { %1980 = vsyncpa [#allocation15], 1 }
 0x70d   :  { %1981 = vsyncpa [#allocation18], 1 }
 0x70e   :  { %1982 = vsyncpa [#allocation21], 1 }
 0x70f   :  { %1983 = vsyncpa [#allocation24], 1 }
 0x710   :  { %1984 = vsyncpa [#allocation27], 1 }
 0x711   :  { %1985 = vsyncpa [#allocation30], 1 }
 0x712   :  { %1986 = vsyncpa [#allocation4], 1 }
 0x713   :  { %1988 = vsyncpa [#allocation4 + $0x1], 1 }

</bundles_post_ra>
